<compile_context>
chip_gen: v7x
topology: tpu7x:2x2x1
jax: 0.10.0
libtpu: 0.0.40
codegen_flags: <defaults>
</compile_context>

<pallas_src>
import math
from functools import partial

import jax
import jax.numpy as jnp
from jax.experimental import pallas as pl
from jax.experimental.pallas import tpu as pltpu


def _lstm_abs_fused_kernel(x_ref, w_emb_ref, b_emb_ref,
                           w_ih_ref, w_hh_ref, b_gates_ref,
                           w_out_ref, b_out_ref,
                           h0_ref, c0_ref,
                           out_ref, h_out_ref, c_out_ref,
                           hrelu_ref):
    T, N, _ = x_ref.shape
    H = h0_ref.shape[-1]
    TN = T * N

    # ---------- batched pre-pass (off the serial path) ----------
    # Embedding_Input + ReLU for all T frames at once.  K=2 contraction stays on the
    # VPU (two FMAs) instead of a 126/128-padded MXU pass; it runs exactly once.
    x = x_ref[...].reshape(TN, 2)                                   # (T*N, 2)
    emb = jnp.maximum(
        x[:, 0:1] * w_emb_ref[0:1, :] + x[:, 1:2] * w_emb_ref[1:2, :]
        + b_emb_ref[...], 0.0)                                      # (T*N, E) f32

    # Input-gate contribution (incl. fused bias b_ih+b_hh) for every timestep in one
    # well-filled MXU pass.  i/f/o columns were prescaled by 0.5 in the wrapper.
    gi = (jnp.dot(emb.astype(jnp.bfloat16), w_ih_ref[...],
                  preferred_element_type=jnp.float32)
          + b_gates_ref[...])                                       # (T*N, 4H) f32

    w_hh = w_hh_ref[...]                                            # bf16, hoisted

    # ---------- serial recurrence, statically unrolled ----------
    h = h0_ref[...]                                                 # (N, H) f32
    c = c0_ref[...]                                                 # (N, H) f32
    for t in range(T):                                              # T is static -> straight-line
        gates = gi[t * N:(t + 1) * N, :] + jnp.dot(
            h.astype(jnp.bfloat16), w_hh, preferred_element_type=jnp.float32)
        # One full-width tanh gives all four gates (sigmoid via prescaled tanh).
        tg = jnp.tanh(gates)                                        # (N, 4H)
        i_g = 0.5 * (tg[:, 0 * H:1 * H] + 1.0)
        f_g = 0.5 * (tg[:, 1 * H:2 * H] + 1.0)
        g_g = tg[:, 2 * H:3 * H]
        o_g = 0.5 * (tg[:, 3 * H:4 * H] + 1.0)
        c = f_g * c + i_g * g_g
        h = o_g * jnp.tanh(c)
        hrelu_ref[t * N:(t + 1) * N, :] = jnp.maximum(h, 0.0)       # stash ReLU(h_t)

    h_out_ref[...] = h
    c_out_ref[...] = c

    # ---------- batched post-pass: I_Output, lane-dense 128-wide slab ----------
    out = (jnp.dot(hrelu_ref[...].astype(jnp.bfloat16), w_out_ref[...],
                   preferred_element_type=jnp.float32)
           + b_out_ref[...])                                        # (T*N, OUT_PAD) f32
    out_ref[...] = out.reshape(out_ref.shape)


@partial(jax.jit, static_argnames=("nmixtures",))
def model_lstm_abs_forward_seq(xabs_seq, params, h0, c0, *, nmixtures):
    """Run T successive Model_LSTM_abs.forward steps in one fused Pallas kernel.

    xabs_seq: (T, N, 2); h0/c0: (1, N, H) (PyTorch LSTM state layout).
    Returns (out_seq (T, N, 6*M), (h1, c1)) with h1/c1 shaped (1, N, H).
    """
    T, N, _ = xabs_seq.shape
    H = h0.shape[-1]
    E = params["w_emb"].shape[-1]
    out_size = 6 * nmixtures
    out_pad = max(128, ((out_size + 127) // 128) * 128)   # lane-dense output width
    n_pad = ((N + 7) // 8) * 8                            # sublane-aligned batch

    # Prescale i/f/o gate columns by 0.5 so a single tanh yields all four gates
    # (sigmoid(x) = 0.5*(tanh(x/2)+1), exact).  Fuse the two LSTM biases.
    gate_scale = jnp.concatenate(
        [jnp.full((H,), 0.5), jnp.full((H,), 0.5),
         jnp.ones((H,)), jnp.full((H,), 0.5)]).astype(jnp.float32)  # (4H,)
    w_ih = (params["w_ih"] * gate_scale[None, :]).astype(jnp.bfloat16)   # (E, 4H)
    w_hh = (params["w_hh"] * gate_scale[None, :]).astype(jnp.bfloat16)   # (H, 4H)
    b_gates = ((params["b_ih"] + params["b_hh"]) * gate_scale[None, :]
               ).astype(jnp.float32)                                     # (1, 4H)

    # Zero-pad I_Output to a 128-wide lane-dense slab (sliced back outside the kernel).
    w_out = jnp.zeros((H, out_pad), jnp.float32).at[:, :out_size].set(
        params["w_out"]).astype(jnp.bfloat16)
    b_out = jnp.zeros((1, out_pad), jnp.float32).at[:, :out_size].set(params["b_out"])

    x = xabs_seq.astype(jnp.float32)
    h0_2d = h0.reshape(N, H).astype(jnp.float32)
    c0_2d = c0.reshape(N, H).astype(jnp.float32)
    if n_pad != N:
        x = jnp.pad(x, ((0, 0), (0, n_pad - N), (0, 0)))
        h0_2d = jnp.pad(h0_2d, ((0, n_pad - N), (0, 0)))
        c0_2d = jnp.pad(c0_2d, ((0, n_pad - N), (0, 0)))

    flops = int(2 * T * n_pad * (2 * E + E * 4 * H + H * 4 * H + H * out_pad))
    transcendentals = int(T * n_pad * 5 * H)
    bytes_accessed = int(
        x.size * 4 + (w_ih.size + w_hh.size + w_out.size) * 2
        + (b_gates.size + b_out.size + 2 * E + E) * 4
        + 2 * n_pad * H * 4                       # h0, c0 in
        + T * n_pad * out_pad * 4 + 2 * n_pad * H * 4)   # outputs

    def full(shape):
        return pl.BlockSpec(shape, lambda i, _s=shape: (0,) * len(_s))

    out_pad_seq, h1, c1 = pl.pallas_call(
        _lstm_abs_fused_kernel,
        out_shape=(jax.ShapeDtypeStruct((T, n_pad, out_pad), jnp.float32),
                   jax.ShapeDtypeStruct((n_pad, H), jnp.float32),
                   jax.ShapeDtypeStruct((n_pad, H), jnp.float32)),
        grid=(1,),
        in_specs=[
            full((T, n_pad, 2)),          # xabs sequence (whole slab resident)
            full((2, E)), full((1, E)),   # embedding
            full((E, 4 * H)),             # w_ih (prescaled, bf16)
            full((H, 4 * H)),             # w_hh (prescaled, bf16)
            full((1, 4 * H)),             # fused gate bias (f32)
            full((H, out_pad)),           # w_out (padded, bf16)
            full((1, out_pad)),           # b_out (padded, f32)
            full((n_pad, H)),             # h0
            full((n_pad, H)),             # c0
        ],
        out_specs=(full((T, n_pad, out_pad)),
                   full((n_pad, H)),
                   full((n_pad, H))),
        scratch_shapes=[pltpu.VMEM((T * n_pad, H), jnp.float32)],   # ReLU(h_t) stash
        compiler_params=pltpu.CompilerParams(
            dimension_semantics=("arbitrary",)),
        cost_estimate=pl.CostEstimate(flops=flops,
                                      transcendentals=transcendentals,
                                      bytes_accessed=bytes_accessed),
    )(x, params["w_emb"].astype(jnp.float32), params["b_emb"].astype(jnp.float32),
      w_ih, w_hh, b_gates, w_out, b_out, h0_2d, c0_2d)

    out_seq = out_pad_seq[:, :N, :out_size]
    return out_seq, (h1[:N][None], c1[:N][None])


def model_lstm_abs_forward(xabs, params, h0, c0, nmixtures):
    """Single-step forward matching PyTorch Model_LSTM_abs.forward exactly."""
    out_seq, (h1, c1) = model_lstm_abs_forward_seq(
        xabs[None], params, h0, c0, nmixtures=nmixtures)
    out = out_seq[0]                                        # (N, 6M)
    splits = tuple(out[:, k * nmixtures:(k + 1) * nmixtures] for k in range(6))
    return splits, (h1, c1)


def init_params(key, embedding_size, rnn_size, nmixtures):
    """Deterministic init mirroring PyTorch shapes (weights stored transposed)."""
    E, H, M = embedding_size, rnn_size, nmixtures
    out_size = 6 * M
    ks = jax.random.split(key, 8)

    def unif(k, shape, fan_in):
        bound = 1.0 / math.sqrt(fan_in)
        return jax.random.uniform(k, shape, jnp.float32, -bound, bound)

    return {
        # Embedding_Input: Linear(2, E)
        "w_emb": unif(ks[0], (2, E), 2),
        "b_emb": unif(ks[1], (1, E), 2),
        # I_LSTM: LSTM(E, H), single layer
        "w_ih": unif(ks[2], (E, 4 * H), H),
        "b_ih": unif(ks[3], (1, 4 * H), H),
        "w_hh": unif(ks[4], (H, 4 * H), H),
        "b_hh": unif(ks[5], (1, 4 * H), H),
        # I_Output: Linear(H, 6*M)
        "w_out": unif(ks[6], (H, out_size), H),
        "b_out": unif(ks[7], (1, out_size), H),
    }


def _reference_seq(xabs_seq, params, h0, c0):
    """Pure-JAX f32 reference (PyTorch semantics) for correctness checking."""
    H = h0.shape[-1]

    def step(carry, x):
        h, c = carry
        emb = jnp.maximum(x @ params["w_emb"] + params["b_emb"], 0.0)
        gates = (emb @ params["w_ih"] + params["b_ih"]
                 + h @ params["w_hh"] + params["b_hh"])
        i = jax.nn.sigmoid(gates[:, 0 * H:1 * H])
        f = jax.nn.sigmoid(gates[:, 1 * H:2 * H])
        g = jnp.tanh(gates[:, 2 * H:3 * H])
        o = jax.nn.sigmoid(gates[:, 3 * H:4 * H])
        c = f * c + i * g
        h = o * jnp.tanh(c)
        out = jnp.maximum(h, 0.0) @ params["w_out"] + params["b_out"]
        return (h, c), out

    (h, c), outs = jax.lax.scan(step, (h0[0], c0[0]), xabs_seq)
    return outs, (h[None], c[None])


if __name__ == "__main__":
    # Small shapes implied by the module: N pedestrians with (x, y) positions,
    # T = observe_length + predict_length timesteps.
    N = 8            # number of pedestrians in the frame (batch)
    E = 32           # args.embedding_size
    H = 32           # args.rnn_size
    M = 4            # args.nmixtures -> output_size = 24
    T = 8            # fused timesteps (observe_length + predict_length)

    key = jax.random.PRNGKey(0)
    k_param, k_x = jax.random.split(key)

    params = init_params(k_param, E, H, M)
    xabs_seq = jax.random.normal(k_x, (T, N, 2), jnp.float32)

    # init_target_hidden_states(): zeros of shape (num_layers=1, N, rnn_size)
    i_h0 = jnp.zeros((1, N, H), jnp.float32)
    i_c0 = jnp.zeros((1, N, H), jnp.float32)

    # Fused multi-step kernel (equivalent to T successive forward() calls).
    out_seq, (h1, c1) = model_lstm_abs_forward_seq(xabs_seq, params, i_h0, i_c0,
                                                   nmixtures=M)
    jax.block_until_ready((out_seq, h1, c1))

    # Correctness vs. pure-JAX f32 PyTorch-semantics reference.
    # Tolerance accounts for bf16 MXU operands (f32 accumulation) in the kernel.
    ref_out, (ref_h, ref_c) = _reference_seq(xabs_seq, params, i_h0, i_c0)
    assert jnp.allclose(out_seq, ref_out, rtol=2e-2, atol=2e-2)
    assert jnp.allclose(h1, ref_h, rtol=2e-2, atol=2e-2)
    assert jnp.allclose(c1, ref_c, rtol=2e-2, atol=2e-2)

    # Single-step API identical to the original module's forward().
    (mu1, mu2, log_sigma1, log_sigma2, rho, pi_logits), (h_s, c_s) = \
        model_lstm_abs_forward(xabs_seq[0], params, i_h0, i_c0, M)
    jax.block_until_ready((mu1, pi_logits, h_s, c_s))
    assert jnp.allclose(mu1, ref_out[0][:, :M], rtol=2e-2, atol=2e-2)

    assert out_seq.shape == (T, N, 6 * M)
    assert mu1.shape == (N, M) and pi_logits.shape == (N, M)
    assert h1.shape == (1, N, H) and c1.shape == (1, N, H)
    print("KERNEL_OK")
</pallas_src>

<mosaic_0001>
module attributes {stable_mosaic.version = 11 : i64} {
  func.func @_lstm_abs_fused_kernel(%arg0: i32, %arg1: memref<8x8x2xf32, #tpu.memory_space<vmem>>, %arg2: memref<2x32xf32, #tpu.memory_space<vmem>>, %arg3: memref<1x32xf32, #tpu.memory_space<vmem>>, %arg4: memref<32x128xbf16, #tpu.memory_space<vmem>>, %arg5: memref<32x128xbf16, #tpu.memory_space<vmem>>, %arg6: memref<1x128xf32, #tpu.memory_space<vmem>>, %arg7: memref<32x128xbf16, #tpu.memory_space<vmem>>, %arg8: memref<1x128xf32, #tpu.memory_space<vmem>>, %arg9: memref<8x32xf32, #tpu.memory_space<vmem>>, %arg10: memref<8x32xf32, #tpu.memory_space<vmem>>, %arg11: memref<8x8x128xf32, #tpu.memory_space<vmem>>, %arg12: memref<8x32xf32, #tpu.memory_space<vmem>>, %arg13: memref<8x32xf32, #tpu.memory_space<vmem>>, %arg14: memref<64x32xf32, #tpu.memory_space<vmem>>) attributes {dimension_semantics = [#tpu.dimension_semantics<arbitrary>], iteration_bounds = array<i64: 1>, scalar_prefetch = 0 : i64, scratch_operands = 1 : i64, tpu.core_type = #tpu.core_type<tc>, window_params = [{pipeline_mode = #tpu.pipeline_mode<synchronous>, transform_indices = @transform_0, window_bounds = array<i64: 8, 8, 2>}, {pipeline_mode = #tpu.pipeline_mode<synchronous>, transform_indices = @transform_1, window_bounds = array<i64: 2, 32>}, {pipeline_mode = #tpu.pipeline_mode<synchronous>, transform_indices = @transform_2, window_bounds = array<i64: 1, 32>}, {pipeline_mode = #tpu.pipeline_mode<synchronous>, transform_indices = @transform_3, window_bounds = array<i64: 32, 128>}, {pipeline_mode = #tpu.pipeline_mode<synchronous>, transform_indices = @transform_4, window_bounds = array<i64: 32, 128>}, {pipeline_mode = #tpu.pipeline_mode<synchronous>, transform_indices = @transform_5, window_bounds = array<i64: 1, 128>}, {pipeline_mode = #tpu.pipeline_mode<synchronous>, transform_indices = @transform_6, window_bounds = array<i64: 32, 128>}, {pipeline_mode = #tpu.pipeline_mode<synchronous>, transform_indices = @transform_7, window_bounds = array<i64: 1, 128>}, {pipeline_mode = #tpu.pipeline_mode<synchronous>, transform_indices = @transform_8, window_bounds = array<i64: 8, 32>}, {pipeline_mode = #tpu.pipeline_mode<synchronous>, transform_indices = @transform_9, window_bounds = array<i64: 8, 32>}, {pipeline_mode = #tpu.pipeline_mode<synchronous>, transform_indices = @transform_10, window_bounds = array<i64: 8, 8, 128>}, {pipeline_mode = #tpu.pipeline_mode<synchronous>, transform_indices = @transform_11, window_bounds = array<i64: 8, 32>}, {pipeline_mode = #tpu.pipeline_mode<synchronous>, transform_indices = @transform_12, window_bounds = array<i64: 8, 32>}]} {
    %c0 = arith.constant 0 : index
    %c0_0 = arith.constant 0 : index
    %c0_1 = arith.constant 0 : index
    %0 = vector.load %arg1[%c0, %c0_0, %c0_1] : memref<8x8x2xf32, #tpu.memory_space<vmem>>, vector<8x8x2xf32>
    %1 = vector.shape_cast %0 : vector<8x8x2xf32> to vector<64x2xf32>
    %2 = vector.extract_strided_slice %1 {offsets = [0, 0], sizes = [64, 1], strides = [1, 1]} : vector<64x2xf32> to vector<64x1xf32>
    %c0_2 = arith.constant 0 : index
    %c0_3 = arith.constant 0 : index
    %3 = vector.load %arg2[%c0_2, %c0_3] : memref<2x32xf32, #tpu.memory_space<vmem>>, vector<1x32xf32>
    %4 = vector.broadcast %2 : vector<64x1xf32> to vector<64x32xf32>
    %5 = vector.broadcast %3 : vector<1x32xf32> to vector<64x32xf32>
    %6 = arith.mulf %4, %5 : vector<64x32xf32>
    %7 = vector.extract_strided_slice %1 {offsets = [0, 1], sizes = [64, 1], strides = [1, 1]} : vector<64x2xf32> to vector<64x1xf32>
    %c1 = arith.constant 1 : index
    %c0_4 = arith.constant 0 : index
    %8 = vector.load %arg2[%c1, %c0_4] : memref<2x32xf32, #tpu.memory_space<vmem>>, vector<1x32xf32>
    %9 = vector.broadcast %7 : vector<64x1xf32> to vector<64x32xf32>
    %10 = vector.broadcast %8 : vector<1x32xf32> to vector<64x32xf32>
    %11 = arith.mulf %9, %10 : vector<64x32xf32>
    %12 = arith.addf %6, %11 : vector<64x32xf32>
    %c0_5 = arith.constant 0 : index
    %c0_6 = arith.constant 0 : index
    %13 = vector.load %arg3[%c0_5, %c0_6] : memref<1x32xf32, #tpu.memory_space<vmem>>, vector<1x32xf32>
    %14 = vector.broadcast %13 : vector<1x32xf32> to vector<64x32xf32>
    %15 = arith.addf %12, %14 : vector<64x32xf32>
    %cst = arith.constant 0.000000e+00 : f32
    %16 = vector.broadcast %cst : f32 to vector<64x32xf32>
    %17 = arith.maximumf %15, %16 : vector<64x32xf32>
    %18 = arith.truncf %17 : vector<64x32xf32> to vector<64x32xbf16>
    %c0_7 = arith.constant 0 : index
    %c0_8 = arith.constant 0 : index
    %19 = vector.load %arg4[%c0_7, %c0_8] : memref<32x128xbf16, #tpu.memory_space<vmem>>, vector<32x128xbf16>
    %cst_9 = arith.constant dense<0.000000e+00> : vector<64x128xf32>
    %20 = tpu.matmul %18, %19, %cst_9 {dimension_numbers = #tpu.dot_dimension_numbers<[1], [0], [0], [1], [0, 0, 1, 1], [], []>} : vector<64x32xbf16>, vector<32x128xbf16>, vector<64x128xf32> -> vector<64x128xf32>
    %c0_10 = arith.constant 0 : index
    %c0_11 = arith.constant 0 : index
    %21 = vector.load %arg6[%c0_10, %c0_11] : memref<1x128xf32, #tpu.memory_space<vmem>>, vector<1x128xf32>
    %22 = vector.broadcast %21 : vector<1x128xf32> to vector<64x128xf32>
    %23 = arith.addf %20, %22 : vector<64x128xf32>
    %c0_12 = arith.constant 0 : index
    %c0_13 = arith.constant 0 : index
    %24 = vector.load %arg5[%c0_12, %c0_13] : memref<32x128xbf16, #tpu.memory_space<vmem>>, vector<32x128xbf16>
    %c0_14 = arith.constant 0 : index
    %c0_15 = arith.constant 0 : index
    %25 = vector.load %arg9[%c0_14, %c0_15] : memref<8x32xf32, #tpu.memory_space<vmem>>, vector<8x32xf32>
    %c0_16 = arith.constant 0 : index
    %c0_17 = arith.constant 0 : index
    %26 = vector.load %arg10[%c0_16, %c0_17] : memref<8x32xf32, #tpu.memory_space<vmem>>, vector<8x32xf32>
    %27 = vector.extract_strided_slice %23 {offsets = [0, 0], sizes = [8, 128], strides = [1, 1]} : vector<64x128xf32> to vector<8x128xf32>
    %28 = arith.truncf %25 : vector<8x32xf32> to vector<8x32xbf16>
    %cst_18 = arith.constant dense<0.000000e+00> : vector<8x128xf32>
    %29 = tpu.matmul %28, %24, %cst_18 {dimension_numbers = #tpu.dot_dimension_numbers<[1], [0], [0], [1], [0, 0, 1, 1], [], []>} : vector<8x32xbf16>, vector<32x128xbf16>, vector<8x128xf32> -> vector<8x128xf32>
    %30 = arith.addf %27, %29 : vector<8x128xf32>
    %31 = math.tanh %30 : vector<8x128xf32>
    %32 = vector.extract_strided_slice %31 {offsets = [0, 0], sizes = [8, 32], strides = [1, 1]} : vector<8x128xf32> to vector<8x32xf32>
    %cst_19 = arith.constant 1.000000e+00 : f32
    %33 = vector.broadcast %cst_19 : f32 to vector<8x32xf32>
    %34 = arith.addf %32, %33 : vector<8x32xf32>
    %cst_20 = arith.constant 5.000000e-01 : f32
    %35 = vector.broadcast %cst_20 : f32 to vector<8x32xf32>
    %36 = arith.mulf %35, %34 : vector<8x32xf32>
    %37 = vector.extract_strided_slice %31 {offsets = [0, 32], sizes = [8, 32], strides = [1, 1]} : vector<8x128xf32> to vector<8x32xf32>
    %cst_21 = arith.constant 1.000000e+00 : f32
    %38 = vector.broadcast %cst_21 : f32 to vector<8x32xf32>
    %39 = arith.addf %37, %38 : vector<8x32xf32>
    %cst_22 = arith.constant 5.000000e-01 : f32
    %40 = vector.broadcast %cst_22 : f32 to vector<8x32xf32>
    %41 = arith.mulf %40, %39 : vector<8x32xf32>
    %42 = vector.extract_strided_slice %31 {offsets = [0, 64], sizes = [8, 32], strides = [1, 1]} : vector<8x128xf32> to vector<8x32xf32>
    %43 = vector.extract_strided_slice %31 {offsets = [0, 96], sizes = [8, 32], strides = [1, 1]} : vector<8x128xf32> to vector<8x32xf32>
    %cst_23 = arith.constant 1.000000e+00 : f32
    %44 = vector.broadcast %cst_23 : f32 to vector<8x32xf32>
    %45 = arith.addf %43, %44 : vector<8x32xf32>
    %cst_24 = arith.constant 5.000000e-01 : f32
    %46 = vector.broadcast %cst_24 : f32 to vector<8x32xf32>
    %47 = arith.mulf %46, %45 : vector<8x32xf32>
    %48 = arith.mulf %41, %26 : vector<8x32xf32>
    %49 = arith.mulf %36, %42 : vector<8x32xf32>
    %50 = arith.addf %48, %49 : vector<8x32xf32>
    %51 = math.tanh %50 : vector<8x32xf32>
    %52 = arith.mulf %47, %51 : vector<8x32xf32>
    %cst_25 = arith.constant 0.000000e+00 : f32
    %53 = vector.broadcast %cst_25 : f32 to vector<8x32xf32>
    %54 = arith.maximumf %52, %53 : vector<8x32xf32>
    %c0_26 = arith.constant 0 : index
    %c0_27 = arith.constant 0 : index
    %55 = vector.load %arg14[%c0_26, %c0_27] : memref<64x32xf32, #tpu.memory_space<vmem>>, vector<8x32xf32>
    tpu.vector_store %arg14[%c0_26, %c0_27], %54 {strides = array<i32>} : memref<64x32xf32, #tpu.memory_space<vmem>>, vector<8x32xf32>,
    %56 = vector.extract_strided_slice %23 {offsets = [8, 0], sizes = [8, 128], strides = [1, 1]} : vector<64x128xf32> to vector<8x128xf32>
    %57 = arith.truncf %52 : vector<8x32xf32> to vector<8x32xbf16>
    %cst_28 = arith.constant dense<0.000000e+00> : vector<8x128xf32>
    %58 = tpu.matmul %57, %24, %cst_28 {dimension_numbers = #tpu.dot_dimension_numbers<[1], [0], [0], [1], [0, 0, 1, 1], [], []>} : vector<8x32xbf16>, vector<32x128xbf16>, vector<8x128xf32> -> vector<8x128xf32>
    %59 = arith.addf %56, %58 : vector<8x128xf32>
    %60 = math.tanh %59 : vector<8x128xf32>
    %61 = vector.extract_strided_slice %60 {offsets = [0, 0], sizes = [8, 32], strides = [1, 1]} : vector<8x128xf32> to vector<8x32xf32>
    %cst_29 = arith.constant 1.000000e+00 : f32
    %62 = vector.broadcast %cst_29 : f32 to vector<8x32xf32>
    %63 = arith.addf %61, %62 : vector<8x32xf32>
    %cst_30 = arith.constant 5.000000e-01 : f32
    %64 = vector.broadcast %cst_30 : f32 to vector<8x32xf32>
    %65 = arith.mulf %64, %63 : vector<8x32xf32>
    %66 = vector.extract_strided_slice %60 {offsets = [0, 32], sizes = [8, 32], strides = [1, 1]} : vector<8x128xf32> to vector<8x32xf32>
    %cst_31 = arith.constant 1.000000e+00 : f32
    %67 = vector.broadcast %cst_31 : f32 to vector<8x32xf32>
    %68 = arith.addf %66, %67 : vector<8x32xf32>
    %cst_32 = arith.constant 5.000000e-01 : f32
    %69 = vector.broadcast %cst_32 : f32 to vector<8x32xf32>
    %70 = arith.mulf %69, %68 : vector<8x32xf32>
    %71 = vector.extract_strided_slice %60 {offsets = [0, 64], sizes = [8, 32], strides = [1, 1]} : vector<8x128xf32> to vector<8x32xf32>
    %72 = vector.extract_strided_slice %60 {offsets = [0, 96], sizes = [8, 32], strides = [1, 1]} : vector<8x128xf32> to vector<8x32xf32>
    %cst_33 = arith.constant 1.000000e+00 : f32
    %73 = vector.broadcast %cst_33 : f32 to vector<8x32xf32>
    %74 = arith.addf %72, %73 : vector<8x32xf32>
    %cst_34 = arith.constant 5.000000e-01 : f32
    %75 = vector.broadcast %cst_34 : f32 to vector<8x32xf32>
    %76 = arith.mulf %75, %74 : vector<8x32xf32>
    %77 = arith.mulf %70, %50 : vector<8x32xf32>
    %78 = arith.mulf %65, %71 : vector<8x32xf32>
    %79 = arith.addf %77, %78 : vector<8x32xf32>
    %80 = math.tanh %79 : vector<8x32xf32>
    %81 = arith.mulf %76, %80 : vector<8x32xf32>
    %cst_35 = arith.constant 0.000000e+00 : f32
    %82 = vector.broadcast %cst_35 : f32 to vector<8x32xf32>
    %83 = arith.maximumf %81, %82 : vector<8x32xf32>
    %c8 = arith.constant 8 : index
    %c0_36 = arith.constant 0 : index
    %84 = vector.load %arg14[%c8, %c0_36] : memref<64x32xf32, #tpu.memory_space<vmem>>, vector<8x32xf32>
    tpu.vector_store %arg14[%c8, %c0_36], %83 {strides = array<i32>} : memref<64x32xf32, #tpu.memory_space<vmem>>, vector<8x32xf32>,
    %85 = vector.extract_strided_slice %23 {offsets = [16, 0], sizes = [8, 128], strides = [1, 1]} : vector<64x128xf32> to vector<8x128xf32>
    %86 = arith.truncf %81 : vector<8x32xf32> to vector<8x32xbf16>
    %cst_37 = arith.constant dense<0.000000e+00> : vector<8x128xf32>
    %87 = tpu.matmul %86, %24, %cst_37 {dimension_numbers = #tpu.dot_dimension_numbers<[1], [0], [0], [1], [0, 0, 1, 1], [], []>} : vector<8x32xbf16>, vector<32x128xbf16>, vector<8x128xf32> -> vector<8x128xf32>
    %88 = arith.addf %85, %87 : vector<8x128xf32>
    %89 = math.tanh %88 : vector<8x128xf32>
    %90 = vector.extract_strided_slice %89 {offsets = [0, 0], sizes = [8, 32], strides = [1, 1]} : vector<8x128xf32> to vector<8x32xf32>
    %cst_38 = arith.constant 1.000000e+00 : f32
    %91 = vector.broadcast %cst_38 : f32 to vector<8x32xf32>
    %92 = arith.addf %90, %91 : vector<8x32xf32>
    %cst_39 = arith.constant 5.000000e-01 : f32
    %93 = vector.broadcast %cst_39 : f32 to vector<8x32xf32>
    %94 = arith.mulf %93, %92 : vector<8x32xf32>
    %95 = vector.extract_strided_slice %89 {offsets = [0, 32], sizes = [8, 32], strides = [1, 1]} : vector<8x128xf32> to vector<8x32xf32>
    %cst_40 = arith.constant 1.000000e+00 : f32
    %96 = vector.broadcast %cst_40 : f32 to vector<8x32xf32>
    %97 = arith.addf %95, %96 : vector<8x32xf32>
    %cst_41 = arith.constant 5.000000e-01 : f32
    %98 = vector.broadcast %cst_41 : f32 to vector<8x32xf32>
    %99 = arith.mulf %98, %97 : vector<8x32xf32>
    %100 = vector.extract_strided_slice %89 {offsets = [0, 64], sizes = [8, 32], strides = [1, 1]} : vector<8x128xf32> to vector<8x32xf32>
    %101 = vector.extract_strided_slice %89 {offsets = [0, 96], sizes = [8, 32], strides = [1, 1]} : vector<8x128xf32> to vector<8x32xf32>
    %cst_42 = arith.constant 1.000000e+00 : f32
    %102 = vector.broadcast %cst_42 : f32 to vector<8x32xf32>
    %103 = arith.addf %101, %102 : vector<8x32xf32>
    %cst_43 = arith.constant 5.000000e-01 : f32
    %104 = vector.broadcast %cst_43 : f32 to vector<8x32xf32>
    %105 = arith.mulf %104, %103 : vector<8x32xf32>
    %106 = arith.mulf %99, %79 : vector<8x32xf32>
    %107 = arith.mulf %94, %100 : vector<8x32xf32>
    %108 = arith.addf %106, %107 : vector<8x32xf32>
    %109 = math.tanh %108 : vector<8x32xf32>
    %110 = arith.mulf %105, %109 : vector<8x32xf32>
    %cst_44 = arith.constant 0.000000e+00 : f32
    %111 = vector.broadcast %cst_44 : f32 to vector<8x32xf32>
    %112 = arith.maximumf %110, %111 : vector<8x32xf32>
    %c16 = arith.constant 16 : index
    %c0_45 = arith.constant 0 : index
    %113 = vector.load %arg14[%c16, %c0_45] : memref<64x32xf32, #tpu.memory_space<vmem>>, vector<8x32xf32>
    tpu.vector_store %arg14[%c16, %c0_45], %112 {strides = array<i32>} : memref<64x32xf32, #tpu.memory_space<vmem>>, vector<8x32xf32>,
    %114 = vector.extract_strided_slice %23 {offsets = [24, 0], sizes = [8, 128], strides = [1, 1]} : vector<64x128xf32> to vector<8x128xf32>
    %115 = arith.truncf %110 : vector<8x32xf32> to vector<8x32xbf16>
    %cst_46 = arith.constant dense<0.000000e+00> : vector<8x128xf32>
    %116 = tpu.matmul %115, %24, %cst_46 {dimension_numbers = #tpu.dot_dimension_numbers<[1], [0], [0], [1], [0, 0, 1, 1], [], []>} : vector<8x32xbf16>, vector<32x128xbf16>, vector<8x128xf32> -> vector<8x128xf32>
    %117 = arith.addf %114, %116 : vector<8x128xf32>
    %118 = math.tanh %117 : vector<8x128xf32>
    %119 = vector.extract_strided_slice %118 {offsets = [0, 0], sizes = [8, 32], strides = [1, 1]} : vector<8x128xf32> to vector<8x32xf32>
    %cst_47 = arith.constant 1.000000e+00 : f32
    %120 = vector.broadcast %cst_47 : f32 to vector<8x32xf32>
    %121 = arith.addf %119, %120 : vector<8x32xf32>
    %cst_48 = arith.constant 5.000000e-01 : f32
    %122 = vector.broadcast %cst_48 : f32 to vector<8x32xf32>
    %123 = arith.mulf %122, %121 : vector<8x32xf32>
    %124 = vector.extract_strided_slice %118 {offsets = [0, 32], sizes = [8, 32], strides = [1, 1]} : vector<8x128xf32> to vector<8x32xf32>
    %cst_49 = arith.constant 1.000000e+00 : f32
    %125 = vector.broadcast %cst_49 : f32 to vector<8x32xf32>
    %126 = arith.addf %124, %125 : vector<8x32xf32>
    %cst_50 = arith.constant 5.000000e-01 : f32
    %127 = vector.broadcast %cst_50 : f32 to vector<8x32xf32>
    %128 = arith.mulf %127, %126 : vector<8x32xf32>
    %129 = vector.extract_strided_slice %118 {offsets = [0, 64], sizes = [8, 32], strides = [1, 1]} : vector<8x128xf32> to vector<8x32xf32>
    %130 = vector.extract_strided_slice %118 {offsets = [0, 96], sizes = [8, 32], strides = [1, 1]} : vector<8x128xf32> to vector<8x32xf32>
    %cst_51 = arith.constant 1.000000e+00 : f32
    %131 = vector.broadcast %cst_51 : f32 to vector<8x32xf32>
    %132 = arith.addf %130, %131 : vector<8x32xf32>
    %cst_52 = arith.constant 5.000000e-01 : f32
    %133 = vector.broadcast %cst_52 : f32 to vector<8x32xf32>
    %134 = arith.mulf %133, %132 : vector<8x32xf32>
    %135 = arith.mulf %128, %108 : vector<8x32xf32>
    %136 = arith.mulf %123, %129 : vector<8x32xf32>
    %137 = arith.addf %135, %136 : vector<8x32xf32>
    %138 = math.tanh %137 : vector<8x32xf32>
    %139 = arith.mulf %134, %138 : vector<8x32xf32>
    %cst_53 = arith.constant 0.000000e+00 : f32
    %140 = vector.broadcast %cst_53 : f32 to vector<8x32xf32>
    %141 = arith.maximumf %139, %140 : vector<8x32xf32>
    %c24 = arith.constant 24 : index
    %c0_54 = arith.constant 0 : index
    %142 = vector.load %arg14[%c24, %c0_54] : memref<64x32xf32, #tpu.memory_space<vmem>>, vector<8x32xf32>
    tpu.vector_store %arg14[%c24, %c0_54], %141 {strides = array<i32>} : memref<64x32xf32, #tpu.memory_space<vmem>>, vector<8x32xf32>,
    %143 = vector.extract_strided_slice %23 {offsets = [32, 0], sizes = [8, 128], strides = [1, 1]} : vector<64x128xf32> to vector<8x128xf32>
    %144 = arith.truncf %139 : vector<8x32xf32> to vector<8x32xbf16>
    %cst_55 = arith.constant dense<0.000000e+00> : vector<8x128xf32>
    %145 = tpu.matmul %144, %24, %cst_55 {dimension_numbers = #tpu.dot_dimension_numbers<[1], [0], [0], [1], [0, 0, 1, 1], [], []>} : vector<8x32xbf16>, vector<32x128xbf16>, vector<8x128xf32> -> vector<8x128xf32>
    %146 = arith.addf %143, %145 : vector<8x128xf32>
    %147 = math.tanh %146 : vector<8x128xf32>
    %148 = vector.extract_strided_slice %147 {offsets = [0, 0], sizes = [8, 32], strides = [1, 1]} : vector<8x128xf32> to vector<8x32xf32>
    %cst_56 = arith.constant 1.000000e+00 : f32
    %149 = vector.broadcast %cst_56 : f32 to vector<8x32xf32>
    %150 = arith.addf %148, %149 : vector<8x32xf32>
    %cst_57 = arith.constant 5.000000e-01 : f32
    %151 = vector.broadcast %cst_57 : f32 to vector<8x32xf32>
    %152 = arith.mulf %151, %150 : vector<8x32xf32>
    %153 = vector.extract_strided_slice %147 {offsets = [0, 32], sizes = [8, 32], strides = [1, 1]} : vector<8x128xf32> to vector<8x32xf32>
    %cst_58 = arith.constant 1.000000e+00 : f32
    %154 = vector.broadcast %cst_58 : f32 to vector<8x32xf32>
    %155 = arith.addf %153, %154 : vector<8x32xf32>
    %cst_59 = arith.constant 5.000000e-01 : f32
    %156 = vector.broadcast %cst_59 : f32 to vector<8x32xf32>
    %157 = arith.mulf %156, %155 : vector<8x32xf32>
    %158 = vector.extract_strided_slice %147 {offsets = [0, 64], sizes = [8, 32], strides = [1, 1]} : vector<8x128xf32> to vector<8x32xf32>
    %159 = vector.extract_strided_slice %147 {offsets = [0, 96], sizes = [8, 32], strides = [1, 1]} : vector<8x128xf32> to vector<8x32xf32>
    %cst_60 = arith.constant 1.000000e+00 : f32
    %160 = vector.broadcast %cst_60 : f32 to vector<8x32xf32>
    %161 = arith.addf %159, %160 : vector<8x32xf32>
    %cst_61 = arith.constant 5.000000e-01 : f32
    %162 = vector.broadcast %cst_61 : f32 to vector<8x32xf32>
    %163 = arith.mulf %162, %161 : vector<8x32xf32>
    %164 = arith.mulf %157, %137 : vector<8x32xf32>
    %165 = arith.mulf %152, %158 : vector<8x32xf32>
    %166 = arith.addf %164, %165 : vector<8x32xf32>
    %167 = math.tanh %166 : vector<8x32xf32>
    %168 = arith.mulf %163, %167 : vector<8x32xf32>
    %cst_62 = arith.constant 0.000000e+00 : f32
    %169 = vector.broadcast %cst_62 : f32 to vector<8x32xf32>
    %170 = arith.maximumf %168, %169 : vector<8x32xf32>
    %c32 = arith.constant 32 : index
    %c0_63 = arith.constant 0 : index
    %171 = vector.load %arg14[%c32, %c0_63] : memref<64x32xf32, #tpu.memory_space<vmem>>, vector<8x32xf32>
    tpu.vector_store %arg14[%c32, %c0_63], %170 {strides = array<i32>} : memref<64x32xf32, #tpu.memory_space<vmem>>, vector<8x32xf32>,
    %172 = vector.extract_strided_slice %23 {offsets = [40, 0], sizes = [8, 128], strides = [1, 1]} : vector<64x128xf32> to vector<8x128xf32>
    %173 = arith.truncf %168 : vector<8x32xf32> to vector<8x32xbf16>
    %cst_64 = arith.constant dense<0.000000e+00> : vector<8x128xf32>
    %174 = tpu.matmul %173, %24, %cst_64 {dimension_numbers = #tpu.dot_dimension_numbers<[1], [0], [0], [1], [0, 0, 1, 1], [], []>} : vector<8x32xbf16>, vector<32x128xbf16>, vector<8x128xf32> -> vector<8x128xf32>
    %175 = arith.addf %172, %174 : vector<8x128xf32>
    %176 = math.tanh %175 : vector<8x128xf32>
    %177 = vector.extract_strided_slice %176 {offsets = [0, 0], sizes = [8, 32], strides = [1, 1]} : vector<8x128xf32> to vector<8x32xf32>
    %cst_65 = arith.constant 1.000000e+00 : f32
    %178 = vector.broadcast %cst_65 : f32 to vector<8x32xf32>
    %179 = arith.addf %177, %178 : vector<8x32xf32>
    %cst_66 = arith.constant 5.000000e-01 : f32
    %180 = vector.broadcast %cst_66 : f32 to vector<8x32xf32>
    %181 = arith.mulf %180, %179 : vector<8x32xf32>
    %182 = vector.extract_strided_slice %176 {offsets = [0, 32], sizes = [8, 32], strides = [1, 1]} : vector<8x128xf32> to vector<8x32xf32>
    %cst_67 = arith.constant 1.000000e+00 : f32
    %183 = vector.broadcast %cst_67 : f32 to vector<8x32xf32>
    %184 = arith.addf %182, %183 : vector<8x32xf32>
    %cst_68 = arith.constant 5.000000e-01 : f32
    %185 = vector.broadcast %cst_68 : f32 to vector<8x32xf32>
    %186 = arith.mulf %185, %184 : vector<8x32xf32>
    %187 = vector.extract_strided_slice %176 {offsets = [0, 64], sizes = [8, 32], strides = [1, 1]} : vector<8x128xf32> to vector<8x32xf32>
    %188 = vector.extract_strided_slice %176 {offsets = [0, 96], sizes = [8, 32], strides = [1, 1]} : vector<8x128xf32> to vector<8x32xf32>
    %cst_69 = arith.constant 1.000000e+00 : f32
    %189 = vector.broadcast %cst_69 : f32 to vector<8x32xf32>
    %190 = arith.addf %188, %189 : vector<8x32xf32>
    %cst_70 = arith.constant 5.000000e-01 : f32
    %191 = vector.broadcast %cst_70 : f32 to vector<8x32xf32>
    %192 = arith.mulf %191, %190 : vector<8x32xf32>
    %193 = arith.mulf %186, %166 : vector<8x32xf32>
    %194 = arith.mulf %181, %187 : vector<8x32xf32>
    %195 = arith.addf %193, %194 : vector<8x32xf32>
    %196 = math.tanh %195 : vector<8x32xf32>
    %197 = arith.mulf %192, %196 : vector<8x32xf32>
    %cst_71 = arith.constant 0.000000e+00 : f32
    %198 = vector.broadcast %cst_71 : f32 to vector<8x32xf32>
    %199 = arith.maximumf %197, %198 : vector<8x32xf32>
    %c40 = arith.constant 40 : index
    %c0_72 = arith.constant 0 : index
    %200 = vector.load %arg14[%c40, %c0_72] : memref<64x32xf32, #tpu.memory_space<vmem>>, vector<8x32xf32>
    tpu.vector_store %arg14[%c40, %c0_72], %199 {strides = array<i32>} : memref<64x32xf32, #tpu.memory_space<vmem>>, vector<8x32xf32>,
    %201 = vector.extract_strided_slice %23 {offsets = [48, 0], sizes = [8, 128], strides = [1, 1]} : vector<64x128xf32> to vector<8x128xf32>
    %202 = arith.truncf %197 : vector<8x32xf32> to vector<8x32xbf16>
    %cst_73 = arith.constant dense<0.000000e+00> : vector<8x128xf32>
    %203 = tpu.matmul %202, %24, %cst_73 {dimension_numbers = #tpu.dot_dimension_numbers<[1], [0], [0], [1], [0, 0, 1, 1], [], []>} : vector<8x32xbf16>, vector<32x128xbf16>, vector<8x128xf32> -> vector<8x128xf32>
    %204 = arith.addf %201, %203 : vector<8x128xf32>
    %205 = math.tanh %204 : vector<8x128xf32>
    %206 = vector.extract_strided_slice %205 {offsets = [0, 0], sizes = [8, 32], strides = [1, 1]} : vector<8x128xf32> to vector<8x32xf32>
    %cst_74 = arith.constant 1.000000e+00 : f32
    %207 = vector.broadcast %cst_74 : f32 to vector<8x32xf32>
    %208 = arith.addf %206, %207 : vector<8x32xf32>
    %cst_75 = arith.constant 5.000000e-01 : f32
    %209 = vector.broadcast %cst_75 : f32 to vector<8x32xf32>
    %210 = arith.mulf %209, %208 : vector<8x32xf32>
    %211 = vector.extract_strided_slice %205 {offsets = [0, 32], sizes = [8, 32], strides = [1, 1]} : vector<8x128xf32> to vector<8x32xf32>
    %cst_76 = arith.constant 1.000000e+00 : f32
    %212 = vector.broadcast %cst_76 : f32 to vector<8x32xf32>
    %213 = arith.addf %211, %212 : vector<8x32xf32>
    %cst_77 = arith.constant 5.000000e-01 : f32
    %214 = vector.broadcast %cst_77 : f32 to vector<8x32xf32>
    %215 = arith.mulf %214, %213 : vector<8x32xf32>
    %216 = vector.extract_strided_slice %205 {offsets = [0, 64], sizes = [8, 32], strides = [1, 1]} : vector<8x128xf32> to vector<8x32xf32>
    %217 = vector.extract_strided_slice %205 {offsets = [0, 96], sizes = [8, 32], strides = [1, 1]} : vector<8x128xf32> to vector<8x32xf32>
    %cst_78 = arith.constant 1.000000e+00 : f32
    %218 = vector.broadcast %cst_78 : f32 to vector<8x32xf32>
    %219 = arith.addf %217, %218 : vector<8x32xf32>
    %cst_79 = arith.constant 5.000000e-01 : f32
    %220 = vector.broadcast %cst_79 : f32 to vector<8x32xf32>
    %221 = arith.mulf %220, %219 : vector<8x32xf32>
    %222 = arith.mulf %215, %195 : vector<8x32xf32>
    %223 = arith.mulf %210, %216 : vector<8x32xf32>
    %224 = arith.addf %222, %223 : vector<8x32xf32>
    %225 = math.tanh %224 : vector<8x32xf32>
    %226 = arith.mulf %221, %225 : vector<8x32xf32>
    %cst_80 = arith.constant 0.000000e+00 : f32
    %227 = vector.broadcast %cst_80 : f32 to vector<8x32xf32>
    %228 = arith.maximumf %226, %227 : vector<8x32xf32>
    %c48 = arith.constant 48 : index
    %c0_81 = arith.constant 0 : index
    %229 = vector.load %arg14[%c48, %c0_81] : memref<64x32xf32, #tpu.memory_space<vmem>>, vector<8x32xf32>
    tpu.vector_store %arg14[%c48, %c0_81], %228 {strides = array<i32>} : memref<64x32xf32, #tpu.memory_space<vmem>>, vector<8x32xf32>,
    %230 = vector.extract_strided_slice %23 {offsets = [56, 0], sizes = [8, 128], strides = [1, 1]} : vector<64x128xf32> to vector<8x128xf32>
    %231 = arith.truncf %226 : vector<8x32xf32> to vector<8x32xbf16>
    %cst_82 = arith.constant dense<0.000000e+00> : vector<8x128xf32>
    %232 = tpu.matmul %231, %24, %cst_82 {dimension_numbers = #tpu.dot_dimension_numbers<[1], [0], [0], [1], [0, 0, 1, 1], [], []>} : vector<8x32xbf16>, vector<32x128xbf16>, vector<8x128xf32> -> vector<8x128xf32>
    %233 = arith.addf %230, %232 : vector<8x128xf32>
    %234 = math.tanh %233 : vector<8x128xf32>
    %235 = vector.extract_strided_slice %234 {offsets = [0, 0], sizes = [8, 32], strides = [1, 1]} : vector<8x128xf32> to vector<8x32xf32>
    %cst_83 = arith.constant 1.000000e+00 : f32
    %236 = vector.broadcast %cst_83 : f32 to vector<8x32xf32>
    %237 = arith.addf %235, %236 : vector<8x32xf32>
    %cst_84 = arith.constant 5.000000e-01 : f32
    %238 = vector.broadcast %cst_84 : f32 to vector<8x32xf32>
    %239 = arith.mulf %238, %237 : vector<8x32xf32>
    %240 = vector.extract_strided_slice %234 {offsets = [0, 32], sizes = [8, 32], strides = [1, 1]} : vector<8x128xf32> to vector<8x32xf32>
    %cst_85 = arith.constant 1.000000e+00 : f32
    %241 = vector.broadcast %cst_85 : f32 to vector<8x32xf32>
    %242 = arith.addf %240, %241 : vector<8x32xf32>
    %cst_86 = arith.constant 5.000000e-01 : f32
    %243 = vector.broadcast %cst_86 : f32 to vector<8x32xf32>
    %244 = arith.mulf %243, %242 : vector<8x32xf32>
    %245 = vector.extract_strided_slice %234 {offsets = [0, 64], sizes = [8, 32], strides = [1, 1]} : vector<8x128xf32> to vector<8x32xf32>
    %246 = vector.extract_strided_slice %234 {offsets = [0, 96], sizes = [8, 32], strides = [1, 1]} : vector<8x128xf32> to vector<8x32xf32>
    %cst_87 = arith.constant 1.000000e+00 : f32
    %247 = vector.broadcast %cst_87 : f32 to vector<8x32xf32>
    %248 = arith.addf %246, %247 : vector<8x32xf32>
    %cst_88 = arith.constant 5.000000e-01 : f32
    %249 = vector.broadcast %cst_88 : f32 to vector<8x32xf32>
    %250 = arith.mulf %249, %248 : vector<8x32xf32>
    %251 = arith.mulf %244, %224 : vector<8x32xf32>
    %252 = arith.mulf %239, %245 : vector<8x32xf32>
    %253 = arith.addf %251, %252 : vector<8x32xf32>
    %254 = math.tanh %253 : vector<8x32xf32>
    %255 = arith.mulf %250, %254 : vector<8x32xf32>
    %cst_89 = arith.constant 0.000000e+00 : f32
    %256 = vector.broadcast %cst_89 : f32 to vector<8x32xf32>
    %257 = arith.maximumf %255, %256 : vector<8x32xf32>
    %c56 = arith.constant 56 : index
    %c0_90 = arith.constant 0 : index
    %258 = vector.load %arg14[%c56, %c0_90] : memref<64x32xf32, #tpu.memory_space<vmem>>, vector<8x32xf32>
    tpu.vector_store %arg14[%c56, %c0_90], %257 {strides = array<i32>} : memref<64x32xf32, #tpu.memory_space<vmem>>, vector<8x32xf32>,
    %c0_91 = arith.constant 0 : index
    %c0_92 = arith.constant 0 : index
    %259 = vector.load %arg12[%c0_91, %c0_92] : memref<8x32xf32, #tpu.memory_space<vmem>>, vector<8x32xf32>
    tpu.vector_store %arg12[%c0_91, %c0_92], %255 {strides = array<i32>} : memref<8x32xf32, #tpu.memory_space<vmem>>, vector<8x32xf32>,
    %c0_93 = arith.constant 0 : index
    %c0_94 = arith.constant 0 : index
    %260 = vector.load %arg13[%c0_93, %c0_94] : memref<8x32xf32, #tpu.memory_space<vmem>>, vector<8x32xf32>
    tpu.vector_store %arg13[%c0_93, %c0_94], %253 {strides = array<i32>} : memref<8x32xf32, #tpu.memory_space<vmem>>, vector<8x32xf32>,
    %c0_95 = arith.constant 0 : index
    %c0_96 = arith.constant 0 : index
    %261 = vector.load %arg14[%c0_95, %c0_96] : memref<64x32xf32, #tpu.memory_space<vmem>>, vector<64x32xf32>
    %262 = arith.truncf %261 : vector<64x32xf32> to vector<64x32xbf16>
    %c0_97 = arith.constant 0 : index
    %c0_98 = arith.constant 0 : index
    %263 = vector.load %arg7[%c0_97, %c0_98] : memref<32x128xbf16, #tpu.memory_space<vmem>>, vector<32x128xbf16>
    %cst_99 = arith.constant dense<0.000000e+00> : vector<64x128xf32>
    %264 = tpu.matmul %262, %263, %cst_99 {dimension_numbers = #tpu.dot_dimension_numbers<[1], [0], [0], [1], [0, 0, 1, 1], [], []>} : vector<64x32xbf16>, vector<32x128xbf16>, vector<64x128xf32> -> vector<64x128xf32>
    %c0_100 = arith.constant 0 : index
    %c0_101 = arith.constant 0 : index
    %265 = vector.load %arg8[%c0_100, %c0_101] : memref<1x128xf32, #tpu.memory_space<vmem>>, vector<1x128xf32>
    %266 = vector.broadcast %265 : vector<1x128xf32> to vector<64x128xf32>
    %267 = arith.addf %264, %266 : vector<64x128xf32>
    %268 = vector.shape_cast %267 : vector<64x128xf32> to vector<8x8x128xf32>
    %c0_102 = arith.constant 0 : index
    %c0_103 = arith.constant 0 : index
    %c0_104 = arith.constant 0 : index
    %269 = vector.load %arg11[%c0_102, %c0_103, %c0_104] : memref<8x8x128xf32, #tpu.memory_space<vmem>>, vector<8x8x128xf32>
    tpu.vector_store %arg11[%c0_102, %c0_103, %c0_104], %268 {strides = array<i32>} : memref<8x8x128xf32, #tpu.memory_space<vmem>>, vector<8x8x128xf32>,
    return
  }
  func.func @transform_0(%arg0: i32) -> (i32, i32, i32) {
    %c0_i32 = arith.constant 0 : i32
    %c0_i32_0 = arith.constant 0 : i32
    %c0_i32_1 = arith.constant 0 : i32
    %c0_i32_2 = arith.constant 0 : i32
    return %c0_i32, %c0_i32_0, %c0_i32_1 : i32, i32, i32
  }
  func.func @transform_1(%arg0: i32) -> (i32, i32) {
    %c0_i32 = arith.constant 0 : i32
    %c0_i32_0 = arith.constant 0 : i32
    %c0_i32_1 = arith.constant 0 : i32
    return %c0_i32, %c0_i32_0 : i32, i32
  }
  func.func @transform_2(%arg0: i32) -> (i32, i32) {
    %c0_i32 = arith.constant 0 : i32
    %c0_i32_0 = arith.constant 0 : i32
    %c0_i32_1 = arith.constant 0 : i32
    return %c0_i32, %c0_i32_0 : i32, i32
  }
  func.func @transform_3(%arg0: i32) -> (i32, i32) {
    %c0_i32 = arith.constant 0 : i32
    %c0_i32_0 = arith.constant 0 : i32
    %c0_i32_1 = arith.constant 0 : i32
    return %c0_i32, %c0_i32_0 : i32, i32
  }
  func.func @transform_4(%arg0: i32) -> (i32, i32) {
    %c0_i32 = arith.constant 0 : i32
    %c0_i32_0 = arith.constant 0 : i32
    %c0_i32_1 = arith.constant 0 : i32
    return %c0_i32, %c0_i32_0 : i32, i32
  }
  func.func @transform_5(%arg0: i32) -> (i32, i32) {
    %c0_i32 = arith.constant 0 : i32
    %c0_i32_0 = arith.constant 0 : i32
    %c0_i32_1 = arith.constant 0 : i32
    return %c0_i32, %c0_i32_0 : i32, i32
  }
  func.func @transform_6(%arg0: i32) -> (i32, i32) {
    %c0_i32 = arith.constant 0 : i32
    %c0_i32_0 = arith.constant 0 : i32
    %c0_i32_1 = arith.constant 0 : i32
    return %c0_i32, %c0_i32_0 : i32, i32
  }
  func.func @transform_7(%arg0: i32) -> (i32, i32) {
    %c0_i32 = arith.constant 0 : i32
    %c0_i32_0 = arith.constant 0 : i32
    %c0_i32_1 = arith.constant 0 : i32
    return %c0_i32, %c0_i32_0 : i32, i32
  }
  func.func @transform_8(%arg0: i32) -> (i32, i32) {
    %c0_i32 = arith.constant 0 : i32
    %c0_i32_0 = arith.constant 0 : i32
    %c0_i32_1 = arith.constant 0 : i32
    return %c0_i32, %c0_i32_0 : i32, i32
  }
  func.func @transform_9(%arg0: i32) -> (i32, i32) {
    %c0_i32 = arith.constant 0 : i32
    %c0_i32_0 = arith.constant 0 : i32
    %c0_i32_1 = arith.constant 0 : i32
    return %c0_i32, %c0_i32_0 : i32, i32
  }
  func.func @transform_10(%arg0: i32) -> (i32, i32, i32) {
    %c0_i32 = arith.constant 0 : i32
    %c0_i32_0 = arith.constant 0 : i32
    %c0_i32_1 = arith.constant 0 : i32
    %c0_i32_2 = arith.constant 0 : i32
    return %c0_i32, %c0_i32_0, %c0_i32_1 : i32, i32, i32
  }
  func.func @transform_11(%arg0: i32) -> (i32, i32) {
    %c0_i32 = arith.constant 0 : i32
    %c0_i32_0 = arith.constant 0 : i32
    %c0_i32_1 = arith.constant 0 : i32
    return %c0_i32, %c0_i32_0 : i32, i32
  }
  func.func @transform_12(%arg0: i32) -> (i32, i32) {
    %c0_i32 = arith.constant 0 : i32
    %c0_i32_0 = arith.constant 0 : i32
    %c0_i32_1 = arith.constant 0 : i32
    return %c0_i32, %c0_i32_0 : i32, i32
  }
}

</mosaic_0001>

<bundles_post_ra>
// kernel: model_lstm_abs_forward_seq.1
= control target key start
LH: loop header
LB: loop body
LE: loop exit
PB: predicated region body
PF: predicated region fallthrough
CT: control target
= control target key end

     0   :  { %18 = vsyncpa [#allocation4], 0  ;;  %v1352_v2 = vmov 1   ;;  %v1353_v4 = vmov 0   ;;  %s1725_s0 = inlined_call_operand.vmem [shape: f32[8,8,2], index: 0, kind: input, shape index: {}]   ;;  %s1726_s1 = inlined_call_operand.vmem [shape: f32[2,32], index: 1, kind: input, shape index: {}]   ;;  %s1727_s2 = inlined_call_operand.vmem [shape: f32[1,32], index: 2, kind: input, shape index: {}]   ;;  %s1728_s3 = inlined_call_operand.vmem [shape: bf16[32,128], index: 3, kind: input, shape index: {}]   ;;  %s1729_s4 = inlined_call_operand.vmem [shape: bf16[32,128], index: 4, kind: input, shape index: {}]   ;;  %s1730_s5 = inlined_call_operand.vmem [shape: f32[1,128], index: 5, kind: input, shape index: {}]   ;;  %s1731_s6 = inlined_call_operand.vmem [shape: bf16[32,128], index: 6, kind: input, shape index: {}]   ;;  %s1732_s7 = inlined_call_operand.vmem [shape: f32[1,128], index: 7, kind: input, shape index: {}]   ;;  %s1733_s8 = inlined_call_operand.vmem [shape: f32[8,32], index: 8, kind: input, shape index: {}]   ;;  %s1734_s9 = inlined_call_operand.vmem [shape: f32[8,32], index: 9, kind: input, shape index: {}]   ;;  %s1735_s10 = inlined_call_operand.hbm [shape: f32[8,8,128], index: 10, kind: output, shape index: {0}]   ;;  %s1736_s11 = inlined_call_operand.hbm [shape: f32[8,32], index: 11, kind: output, shape index: {1}]   ;;  %s1737_s12 = inlined_call_operand.hbm [shape: f32[8,32], index: 12, kind: output, shape index: {2}]  }
   0x1   :  { %v47_v0 = vld [vmem:[%s1725_s0 + $0x30] sm:$0xff]  ;;  %v45_v1 = vld [vmem:[%s1725_s0 + $0x20] sm:$0xff]  ;;  %1236 = vset.pattern.permute.xlu0 %v1352_v2  ;;  %1234 = vset.pattern.permute.xlu1 %v1352_v2  ;;  %v46_v3 = vld [vmem:[%s1725_s0 + $0x28] sm:$0xff] }
   0x2   :  { %128 = vperm.xlu0 %1236, %v47_v0   ;;  %120 = vperm.xlu1 %1234, %v45_v1  }
   0x6   :  { %1237 = vset.pattern.permute.xlu0 %v1353_v4  ;;  %124 = vperm.xlu1 %1234, %v46_v3  }
   0x7   :  { %72 = vperm.xlu0 %1237, %v45_v1  }
   0x8   :  { %19 = vsyncpa [#allocation6], 0  ;;  %v48_v5 = vld [vmem:[%s1725_s0 + $0x38] sm:$0xff]  ;;  %v42_v6 = vld [vmem:[%s1725_s0 + $0x8] sm:$0xff]  ;;  %v1354_v12 = vmov 0.0   ;;  %s1355_s24 = smov 32  }
   0x9   :  { %v1244_v7 = vld [vmem:[%s1728_s3] sm:$0xff]   ;;  %v43_v9 = vld [vmem:[%s1725_s0 + $0x10] sm:$0xff]  ;;  %v1245_v10 = vld [vmem:[%s1728_s3 + $0x8] sm:$0xff]   ;;  %vm205_vm0 = vcmask 261120   ;;  %vm1356_vm1 = vmmov 0   ;;  %s1359_s19 = smov [#allocation5]  }
   0xa   :  { %1235 = vset.pattern.permute.xlu1 %v1353_v4  ;;  %v41_v8 = vld [vmem:[%s1725_s0] sm:$0xff]  ;;  %1218 = vmatprep.subr.bf16.mxu1 %v1244_v7  ;;  %v44_v11 = vld [vmem:[%s1725_s0 + $0x18] sm:$0xff]  ;;  %v1505_v54 = vld [vmem:[%s1729_s4 + $0x8] sm:$0xff]   ;;  %s1042_s20 = sshll.u32 %s1359_s19, 4  ;;  %s1043_s20 = int_to_ptr.vmem [resolvable:$true] %s1042_s20 }
   0xb   :  { %77 = vperm.xlu0 %1237, %v46_v3   ;;  %87 = vperm.xlu1 %1235, %v48_v5   ;;  %v288_v13 = vld [vmem:[%s1734_s9] sm:$0xff]  ;;  %s1282_s21 = scalar_lea.vmem %s1043_s20, 128  ;;  %p1287_p1 = scmp.lt.s32.totalorder %s1043_s20, %s1043_s20 }
   0xc   :  { %1130 = vmatprep.subr.bf16.mxu0 %v1244_v7  ;;  %1220 = vmatpush3.bf16.msra.mxu1 %v1244_v7  ;;  %v1468_v16 = vld [vmem:[%s1726_s1 + $0x1] ss:$0 sm:$0xff]  ;;  %v1473_v17 = vld [vmem:[%s1726_s1] ss:$0 sm:$0xff]  ;;  %p1283_p0 = scmp.ne.s32.totalorder %s1043_s20, %s1282_s21  ;;  %p1288_p2 = scmp.lt.s32.totalorder %s1282_s21, %s1282_s21 }
   0xd   :  { %1131 = vmatpush3.bf16.msra.mxu0 %v1244_v7  ;;  %1219 = vmatprep.subr.bf16.mxu1 %v1245_v10  ;;  %v1480_v25 = vld [vmem:[%s1727_s2] ss:$0 sm:$0xff] }
   0xe   :  { %1132 = vmatprep.subr.bf16.mxu0 %v1245_v10  ;;  %v1496_v48 = vld [vmem:[%s1729_s4] sm:$0xff]   ;;  %p1289_p3 = por %p1288_p2, %p1287_p1 }
   0xf   :  { %82 = vperm.xlu0 %1237, %v47_v0   ;;  %1238 = vset.pattern.permute.xlu1 %v1352_v2  ;;  %v287_v55 = vld [vmem:[%s1733_s8] sm:$0xff] }
  0x10   :  { %132 = vperm.xlu1 %1238, %v48_v5   ;;  %1221 = vmatpush3.bf16.msra.mxu1 %v1245_v10  ;;  %v289_v60 = vpack.c.bf16 %v287_v55, %v287_v55  ;;  %p1290_p4 = pnand %p1289_p3, %p1283_p0 }
  0x11   :  { %1133 = vmatpush3.bf16.msra.mxu0 %v1245_v10  ;;  %1142 = vmatprep.subr.bf16.mxu1 %v1354_v12 }
  0x12   :  { %1158 = vmatprep.subr.bf16.mxu0 %v1354_v12 }
  0x13   :  { %57 = vperm.xlu0 %1237, %v42_v6  }
  0x14   :  { %1239 = vset.pattern.permute.xlu1 %v1353_v4 }
  0x15   :  { %52 = vperm.xlu1 %1239, %v41_v8  }
  0x17   :  { %62 = vperm.xlu0 %1237, %v43_v9  }
  0x19   :  { %1240 = vset.pattern.permute.xlu1 %v1352_v2 }
  0x1a   :  { %104 = vperm.xlu1 %1240, %v41_v8  }
  0x1b   :  { %1242 = vset.pattern.permute.xlu0 %v1352_v2 }
  0x1c   :  { %112 = vperm.xlu0 %1242, %v43_v9  }
  0x1e   :  { %108 = vperm.xlu1 %1240, %v42_v6  }
  0x20   :  { %350 = vrot.lane.b32.xlu0 %v288_v13, %s1355_s24 }
  0x22   :  { %1241 = vset.pattern.permute.xlu1 %v1353_v4 }
  0x23   :  { %67 = vperm.xlu1 %1241, %v44_v11  }
  0x27   :  { %1243 = vset.pattern.permute.xlu1 %v1352_v2 }
  0x28   :  { %116 = vperm.xlu1 %1243, %v44_v11  }
  0x81   :  { %v121_v14 = vpop.permute.xlu1 %120  ;;  %v129_v15 = vpop.permute.xlu0 %128 }
  0x82   :  { %v143_v20 = vmul.f32 %v1468_v16, %v121_v14  ;;  %v145_v28 = vmul.f32 %v1468_v16, %v129_v15 }
  0x85   :  { %v125_v18 = vpop.permute.xlu1 %124 }
  0x86   :  { %v73_v19 = vpop.permute.xlu0 %72  ;;  %v144_v26 = vmul.f32 %v1468_v16, %v125_v18 }
  0x87   :  { %v98_v21 = vmul.f32 %v1473_v17, %v73_v19 }
  0x89   :  { %v151_v22 = vadd.f32 %v143_v20, %v98_v21 }
  0x8a   :  { %v78_v23 = vpop.permute.xlu0 %77  ;;  %v88_v24 = vpop.permute.xlu1 %87 }
  0x8b   :  { %v99_v27 = vmul.f32 %v1473_v17, %v78_v23  ;;  %v166_v30 = vadd.f32 %v1480_v25, %v151_v22  ;;  %v101_v35 = vmul.f32 %v1473_v17, %v88_v24 }
  0x8d   :  { %v152_v29 = vadd.f32 %v144_v26, %v99_v27  ;;  %v174_v38 = vmax.f32 %v166_v30, 0.0 }
  0x8e   :  { %v83_v31 = vpop.permute.xlu0 %82 }
  0x8f   :  { %v100_v32 = vmul.f32 %v1473_v17, %v83_v31  ;;  %v133_v33 = vpop.permute.xlu1 %132  ;;  %v167_v34 = vadd.f32 %v1480_v25, %v152_v29 }
  0x90   :  { %v146_v36 = vmul.f32 %v1468_v16, %v133_v33 }
  0x91   :  { %v153_v37 = vadd.f32 %v145_v28, %v100_v32  ;;  %v175_v39 = vmax.f32 %v167_v34, 0.0 }
  0x92   :  { %v154_v40 = vadd.f32 %v146_v36, %v101_v35  ;;  %v58_v42 = vpop.permute.xlu0 %57 }
  0x93   :  { %v168_v41 = vadd.f32 %v1480_v25, %v153_v37  ;;  %v180_v43 = vpack.c.bf16 %v175_v39, %v174_v38  ;;  %v95_v58 = vmul.f32 %v1473_v17, %v58_v42 }
  0x94   :  { %v169_v44 = vadd.f32 %v1480_v25, %v154_v40  ;;  %v53_v45 = vpop.permute.xlu1 %52 }
  0x95   :  { %v176_v46 = vmax.f32 %v168_v41, 0.0  ;;  %1138 = vmatprep.mubr.msk.bf16.mxu1 %vm205_vm0, %v180_v43  ;;  %v94_v52 = vmul.f32 %v1473_v17, %v53_v45 }
  0x96   :  { %v177_v47 = vmax.f32 %v169_v44, 0.0  ;;  %v63_v50 = vpop.permute.xlu0 %62 }
  0x97   :  { %v96_v3 = vmul.f32 %v1473_v17, %v63_v50 }
  0x98   :  { %v181_v49 = vpack.c.bf16 %v177_v47, %v176_v46 }
  0x99   :  { %v105_v51 = vpop.permute.xlu1 %104 }
  0x9a   :  { %v139_v53 = vmul.f32 %v1468_v16, %v105_v51  ;;  %1139 = vmatmul.mubr.msk.bf16.vlgmr.msra.gmra.mrb[0].mxu1 %vm205_vm0, %v181_v49 }
  0x9b   :  { %1143 = vmatpush3.bf16.msra.mxu1 %v1496_v48  ;;  %1146 = vmatprep.mubr.msk.bf16.mxu1 %vm1356_vm1, %v1354_v12  ;;  %v113_v61 = vpop.permute.xlu0 %112 }
  0x9c   :  { %v147_v56 = vadd.f32 %v139_v53, %v94_v52  ;;  %1144 = vmatprep.subr.bf16.mxu1 %v1354_v12  ;;  %v141_v0 = vmul.f32 %v1468_v16, %v113_v61 }
  0x9d   :  { %v109_v57 = vpop.permute.xlu1 %108 }
  0x9e   :  { %v140_v59 = vmul.f32 %v1468_v16, %v109_v57  ;;  %v162_v63 = vadd.f32 %v1480_v25, %v147_v56  ;;  %v149_v6 = vadd.f32 %v141_v0, %v96_v3 }
  0x9f   :  { %1145 = vmatpush3.bf16.msra.mxu1 %v1505_v54  ;;  %v351_v45 = vpop.permute.xlu0 %350 }
  0xa0   :  { %v148_v62 = vadd.f32 %v140_v59, %v95_v58  ;;  %1150 = vmatprep.subr.bf16.mxu1 %v1354_v12  ;;  %v170_v4 = vmax.f32 %v162_v63, 0.0  ;;  %v164_v11 = vadd.f32 %v1480_v25, %v149_v6 }
  0xa2   :  { %v68_v1 = vpop.permute.xlu1 %67  ;;  %v163_v2 = vadd.f32 %v1480_v25, %v148_v62  ;;  %1147 = vmatmul.mubr.msk.bf16.vlgmr.msra.gmra.mrb[4].mxu1 %vm205_vm0, %v289_v60  ;;  %v172_v15 = vmax.f32 %v164_v11, 0.0 }
  0xa3   :  { %1151 = vmatpush3.bf16.msra.mxu1 %v1496_v48  ;;  %1154 = vmatprep.mubr.msk.bf16.mxu1 %vm1356_vm1, %v1354_v12  ;;  %v97_v9 = vmul.f32 %v1473_v17, %v68_v1 }
  0xa4   :  { %v171_v5 = vmax.f32 %v163_v2, 0.0  ;;  %1152 = vmatprep.subr.bf16.mxu1 %v1354_v12 }
  0xa6   :  { %v178_v7 = vpack.c.bf16 %v171_v5, %v170_v4 }
  0xa7   :  { %v117_v8 = vpop.permute.xlu1 %116  ;;  %1153 = vmatpush3.bf16.msra.mxu1 %v1505_v54 }
  0xa8   :  { %v142_v10 = vmul.f32 %v1468_v16, %v117_v8  ;;  %1134 = vmatprep.mubr.msk.bf16.mxu0 %vm205_vm0, %v178_v7  ;;  %1166 = vmatprep.subr.bf16.mxu1 %v1354_v12  ;;  %v1070_v16 = vld [vmem:[%s1730_s5] ss:$0 sm:$0xff]  ;;  %s1357_s5 = smov 64  }
  0xaa   :  { %v150_v13 = vadd.f32 %v142_v10, %v97_v9 }
  0xac   :  { %v165_v14 = vadd.f32 %v1480_v25, %v150_v13 }
  0xae   :  { %v173_v18 = vmax.f32 %v165_v14, 0.0 }
  0xb0   :  { %v179_v19 = vpack.c.bf16 %v173_v18, %v172_v15 }
  0xb2   :  { %1135 = vmatmul.mubr.msk.bf16.vlgmr.msra.gmra.mrb[0].mxu0 %vm205_vm0, %v179_v19 }
  0xb3   :  { %1159 = vmatpush3.bf16.msra.mxu0 %v1496_v48  ;;  %1162 = vmatprep.mubr.msk.bf16.mxu0 %vm1356_vm1, %v1354_v12 }
  0xb4   :  { %1160 = vmatprep.subr.bf16.mxu0 %v1354_v12 }
  0xb7   :  { %1161 = vmatpush3.bf16.msra.mxu0 %v1505_v54 }
  0xb8   :  { %1174 = vmatprep.subr.bf16.mxu0 %v1354_v12 }
 0x16d   :  { %v1140_v17 = vpop.f32.mrb[0].mxu1 }
 0x16e   :  { %v1543_v20 = vadd.f32 %v1140_v17, %v1070_v16  ;;  %v268_v21 = vpop.f32.mrb[1].mxu1 }
 0x16f   :  { %v1545_v22 = vadd.f32 %v1070_v16, %v268_v21  ;;  %v1141_v23 = vpop.f32.mrb[2].mxu1 }
 0x170   :  { %v1547_v24 = vadd.f32 %v1141_v23, %v1070_v16  ;;  %v271_v25 = vpop.f32.mrb[3].mxu1 }
 0x171   :  { %v1549_v26 = vadd.f32 %v1070_v16, %v271_v25 }
 0x175   :  { %v339_v27 = vpop.f32.mrb[4].mxu1 }
 0x176   :  { %v1148_v28 = vpop.f32.mrb[5].mxu1 }
 0x177   :  { %v342_v29 = vpop.f32.mrb[6].mxu1 }
 0x178   :  { %v1149_v30 = vpop.f32.mrb[7].mxu1 }
 0x185   :  { %v1136_v31 = vpop.f32.mrb[0].mxu0 }
 0x186   :  { %v1551_v32 = vadd.f32 %v1136_v31, %v1070_v16  ;;  %v252_v33 = vpop.f32.mrb[1].mxu0 }
 0x187   :  { %v253_v34 = vadd.f32 %v1070_v16, %v252_v33  ;;  %v1137_v35 = vpop.f32.mrb[2].mxu0 }
 0x188   :  { %v1553_v36 = vadd.f32 %v1137_v35, %v1070_v16  ;;  %v255_v37 = vpop.f32.mrb[3].mxu0 }
 0x189   :  { %v345_v38 = vadd.f32 %v339_v27, %v253_v34  ;;  %v256_v39 = vadd.f32 %v1070_v16, %v255_v37 }
 0x18b   :  { %1250 = vtanh.f32 %v345_v38 }
 0x195   :  { %v1251_v40 = vpop.eup %1250 }
 0x196   :  { %355 = vrot.lane.b32.xlu1 %v1251_v40, %s1357_s5  ;;  %v347_v41 = vadd.f32 1.0, %v1251_v40 }
 0x198   :  { %v348_v42 = vmul.f32 0.5, %v347_v41 }
 0x19a   :  { %v353_v46 = vmul.f32 %v351_v45, %v348_v42 }
 0x208   :  { %v356_v43 = vpop.permute.xlu1 %355 }
 0x209   :  { %v358_v44 = vmul.f32 %v356_v43, %v348_v42 }
 0x20b   :  { %360 = vrot.lane.b32.xlu1 %v358_v44, %s1355_s24 }
 0x27d   :  { %v361_v47 = vpop.permute.xlu1 %360 }
 0x27e   :  { %v363_v49 = vadd.f32 %v361_v47, %v353_v46 }
 0x280   :  { %1252 = vtanh.f32 %v363_v49 }
 0x28a   :  { %v1253_v50 = vpop.eup %1252 }
 0x28b   :  { %366 = vrot.lane.b32.xlu0 %v1253_v50, %s1357_s5 }
 0x2fd   :  { %v367_v51 = vpop.permute.xlu0 %366 }
 0x2fe   :  { %v1558_v52 = vmul.f32 %v367_v51, %v348_v42 }
 0x300   :  { %v376_v53 = vpack.c.bf16 %v1558_v52, %v1558_v52 }
 0x302   :  { %378 = vrot.lane.b32.xlu1 %v376_v53, %s1355_s24 }
 0x374   :  { %v379_v55 = vpop.permute.xlu1 %378 }
 0x375   :  { %1155 = vmatmul.mubr.msk.bf16.vlgmr.msra.gmra.mrb[8].mxu1 %vm205_vm0, %v379_v55 }
 0x376   :  { %1167 = vmatpush3.bf16.msra.mxu1 %v1496_v48  ;;  %1170 = vmatprep.mubr.msk.bf16.mxu1 %vm1356_vm1, %v1354_v12 }
 0x377   :  { %1168 = vmatprep.subr.bf16.mxu1 %v1354_v12 }
 0x37a   :  { %1169 = vmatpush3.bf16.msra.mxu1 %v1505_v54 }
 0x37b   :  { %1182 = vmatprep.subr.bf16.mxu1 %v1354_v12 }
 0x448   :  { %v417_v56 = vpop.f32.mrb[8].mxu1 }
 0x449   :  { %v423_v57 = vadd.f32 %v417_v56, %v256_v39  ;;  %v1156_v58 = vpop.f32.mrb[9].mxu1 }
 0x44a   :  { %v420_v59 = vpop.f32.mrb[10].mxu1 }
 0x44b   :  { %1254 = vtanh.f32 %v423_v57  ;;  %v1157_v60 = vpop.f32.mrb[11].mxu1 }
 0x455   :  { %v1255_v61 = vpop.eup %1254 }
 0x456   :  { %429 = vrot.lane.b32.xlu0 %v1255_v61, %s1357_s5  ;;  %v425_v62 = vadd.f32 1.0, %v1255_v61 }
 0x458   :  { %v426_v63 = vmul.f32 0.5, %v425_v62 }
 0x45a   :  { %v427_v2 = vmul.f32 %v426_v63, %v363_v49 }
 0x4c8   :  { %v430_v0 = vpop.permute.xlu0 %429 }
 0x4c9   :  { %v432_v1 = vmul.f32 %v430_v0, %v426_v63 }
 0x4cb   :  { %434 = vrot.lane.b32.xlu1 %v432_v1, %s1355_s24 }
 0x53d   :  { %v435_v3 = vpop.permute.xlu1 %434 }
 0x53e   :  { %v437_v4 = vadd.f32 %v435_v3, %v427_v2 }
 0x540   :  { %1256 = vtanh.f32 %v437_v4 }
 0x54a   :  { %v1257_v5 = vpop.eup %1256 }
 0x54b   :  { %440 = vrot.lane.b32.xlu0 %v1257_v5, %s1357_s5 }
 0x5bd   :  { %v441_v6 = vpop.permute.xlu0 %440 }
 0x5be   :  { %v1573_v7 = vmul.f32 %v441_v6, %v426_v63 }
 0x5c0   :  { %v450_v8 = vpack.c.bf16 %v1573_v7, %v1573_v7 }
 0x5c2   :  { %452 = vrot.lane.b32.xlu1 %v450_v8, %s1355_s24 }
 0x634   :  { %v453_v9 = vpop.permute.xlu1 %452 }
 0x635   :  { %1163 = vmatmul.mubr.msk.bf16.vlgmr.msra.gmra.mrb[4].mxu0 %vm205_vm0, %v453_v9 }
 0x636   :  { %1175 = vmatpush3.bf16.msra.mxu0 %v1496_v48  ;;  %1178 = vmatprep.mubr.msk.bf16.mxu0 %vm1356_vm1, %v1354_v12 }
 0x637   :  { %1176 = vmatprep.subr.bf16.mxu0 %v1354_v12 }
 0x63a   :  { %1177 = vmatpush3.bf16.msra.mxu0 %v1505_v54 }
 0x63b   :  { %1190 = vmatprep.subr.bf16.mxu0 %v1354_v12 }
 0x708   :  { %v491_v10 = vpop.f32.mrb[4].mxu0 }
 0x709   :  { %v497_v11 = vadd.f32 %v491_v10, %v1551_v32  ;;  %v1164_v13 = vpop.f32.mrb[5].mxu0 }
 0x70a   :  { %v494_v14 = vpop.f32.mrb[6].mxu0 }
 0x70b   :  { %1258 = vtanh.f32 %v497_v11  ;;  %v1165_v15 = vpop.f32.mrb[7].mxu0 }
 0x715   :  { %v1259_v18 = vpop.eup %1258 }
 0x716   :  { %503 = vrot.lane.b32.xlu0 %v1259_v18, %s1357_s5  ;;  %v499_v19 = vadd.f32 1.0, %v1259_v18 }
 0x718   :  { %v500_v16 = vmul.f32 0.5, %v499_v19 }
 0x71a   :  { %v501_v23 = vmul.f32 %v500_v16, %v437_v4 }
 0x788   :  { %v504_v17 = vpop.permute.xlu0 %503 }
 0x789   :  { %v506_v21 = vmul.f32 %v504_v17, %v500_v16 }
 0x78b   :  { %508 = vrot.lane.b32.xlu1 %v506_v21, %s1355_s24 }
 0x7fd   :  { %v509_v25 = vpop.permute.xlu1 %508 }
 0x7fe   :  { %v511_v27 = vadd.f32 %v509_v25, %v501_v23 }
 0x800   :  { %1260 = vtanh.f32 %v511_v27 }
 0x80a   :  { %v1261_v28 = vpop.eup %1260 }
 0x80b   :  { %514 = vrot.lane.b32.xlu0 %v1261_v28, %s1357_s5 }
 0x87d   :  { %v515_v29 = vpop.permute.xlu0 %514 }
 0x87e   :  { %v1589_v30 = vmul.f32 %v515_v29, %v500_v16 }
 0x880   :  { %v524_v31 = vpack.c.bf16 %v1589_v30, %v1589_v30 }
 0x882   :  { %526 = vrot.lane.b32.xlu1 %v524_v31, %s1355_s24 }
 0x8f4   :  { %v527_v32 = vpop.permute.xlu1 %526 }
 0x8f5   :  { %1171 = vmatmul.mubr.msk.bf16.vlgmr.msra.gmra.mrb[12].mxu1 %vm205_vm0, %v527_v32 }
 0x8f6   :  { %1183 = vmatpush3.bf16.msra.mxu1 %v1496_v48  ;;  %1186 = vmatprep.mubr.msk.bf16.mxu1 %vm1356_vm1, %v1354_v12 }
 0x8f7   :  { %1184 = vmatprep.subr.bf16.mxu1 %v1354_v12 }
 0x8fa   :  { %1185 = vmatpush3.bf16.msra.mxu1 %v1505_v54 }
 0x8fb   :  { %1198 = vmatprep.subr.bf16.mxu1 %v1354_v12 }
 0x9c8   :  { %v565_v33 = vpop.f32.mrb[12].mxu1 }
 0x9c9   :  { %v571_v34 = vadd.f32 %v565_v33, %v1553_v36  ;;  %v1172_v35 = vpop.f32.mrb[13].mxu1 }
 0x9ca   :  { %v568_v37 = vpop.f32.mrb[14].mxu1 }
 0x9cb   :  { %1262 = vtanh.f32 %v571_v34  ;;  %v1173_v38 = vpop.f32.mrb[15].mxu1 }
 0x9d5   :  { %v1263_v39 = vpop.eup %1262 }
 0x9d6   :  { %577 = vrot.lane.b32.xlu0 %v1263_v39, %s1357_s5  ;;  %v573_v40 = vadd.f32 1.0, %v1263_v39 }
 0x9d8   :  { %v574_v41 = vmul.f32 0.5, %v573_v40 }
 0x9da   :  { %v575_v44 = vmul.f32 %v574_v41, %v511_v27 }
 0xa48   :  { %v578_v42 = vpop.permute.xlu0 %577 }
 0xa49   :  { %v580_v43 = vmul.f32 %v578_v42, %v574_v41 }
 0xa4b   :  { %582 = vrot.lane.b32.xlu1 %v580_v43, %s1355_s24 }
 0xabd   :  { %v583_v45 = vpop.permute.xlu1 %582 }
 0xabe   :  { %v585_v46 = vadd.f32 %v583_v45, %v575_v44 }
 0xac0   :  { %1264 = vtanh.f32 %v585_v46 }
 0xaca   :  { %v1265_v47 = vpop.eup %1264 }
 0xacb   :  { %588 = vrot.lane.b32.xlu0 %v1265_v47, %s1357_s5 }
 0xb3d   :  { %v589_v36 = vpop.permute.xlu0 %588 }
 0xb3e   :  { %v1605_v49 = vmul.f32 %v589_v36, %v574_v41 }
 0xb40   :  { %v598_v50 = vpack.c.bf16 %v1605_v49, %v1605_v49 }
 0xb42   :  { %600 = vrot.lane.b32.xlu1 %v598_v50, %s1355_s24 }
 0xbb4   :  { %v601_v51 = vpop.permute.xlu1 %600 }
 0xbb5   :  { %1179 = vmatmul.mubr.msk.bf16.vlgmr.msra.gmra.mrb[8].mxu0 %vm205_vm0, %v601_v51 }
 0xbb6   :  { %1191 = vmatpush3.bf16.msra.mxu0 %v1496_v48  ;;  %1194 = vmatprep.mubr.msk.bf16.mxu0 %vm1356_vm1, %v1354_v12 }
 0xbb7   :  { %1192 = vmatprep.subr.bf16.mxu0 %v1354_v12 }
 0xbba   :  { %1193 = vmatpush3.bf16.msra.mxu0 %v1505_v54 }
 0xc88   :  { %v639_v53 = vpop.f32.mrb[8].mxu0 }
 0xc89   :  { %v645_v55 = vadd.f32 %v639_v53, %v1545_v22  ;;  %v1180_v56 = vpop.f32.mrb[9].mxu0 }
 0xc8a   :  { %v642_v57 = vpop.f32.mrb[10].mxu0 }
 0xc8b   :  { %1266 = vtanh.f32 %v645_v55  ;;  %v1181_v58 = vpop.f32.mrb[11].mxu0 }
 0xc95   :  { %v1267_v59 = vpop.eup %1266 }
 0xc96   :  { %651 = vrot.lane.b32.xlu0 %v1267_v59, %s1357_s5  ;;  %v647_v60 = vadd.f32 1.0, %v1267_v59  ;;  %v370_v59 = vmax.f32 %v1558_v52, 0.0 }
 0xc98   :  { %v648_v61 = vmul.f32 0.5, %v647_v60  ;;  %v518_v60 = vmax.f32 %v1589_v30, 0.0  ;;  %v1248_v30 = vld [vmem:[%s1731_s6] sm:$0xff]  }
 0xc99   :  { %1206 = vmatprep.subr.bf16.mxu0 %v1248_v30 }
 0xc9a   :  { %v649_v0 = vmul.f32 %v648_v61, %v585_v46 }
 0xd08   :  { %v652_v62 = vpop.permute.xlu0 %651 }
 0xd09   :  { %v654_v63 = vmul.f32 %v652_v62, %v648_v61 }
 0xd0b   :  { %656 = vrot.lane.b32.xlu1 %v654_v63, %s1355_s24 }
 0xd7d   :  { %v657_v1 = vpop.permute.xlu1 %656 }
 0xd7e   :  { %v659_v2 = vadd.f32 %v657_v1, %v649_v0 }
 0xd80   :  { %1268 = vtanh.f32 %v659_v2 }
 0xd8a   :  { %v1269_v3 = vpop.eup %1268 }
 0xd8b   :  { %662 = vrot.lane.b32.xlu0 %v1269_v3, %s1357_s5 }
 0xdfd   :  { %v663_v22 = vpop.permute.xlu0 %662 }
 0xdfe   :  { %v1620_v4 = vmul.f32 %v663_v22, %v648_v61  ;;  %v1249_v22 = vld [vmem:[%s1731_s6 + $0x8] sm:$0xff]   ;;  %s1358_s6 = smov 96  }
 0xe00   :  { %v672_v5 = vpack.c.bf16 %v1620_v4, %v1620_v4 }
 0xe02   :  { %674 = vrot.lane.b32.xlu1 %v672_v5, %s1355_s24 }
 0xe74   :  { %v675_v6 = vpop.permute.xlu1 %674 }
 0xe75   :  { %1187 = vmatmul.mubr.msk.bf16.vlgmr.msra.gmra.mrb[16].mxu1 %vm205_vm0, %v675_v6  ;;  %v592_v6 = vmax.f32 %v1605_v49, 0.0 }
 0xe76   :  { %1199 = vmatpush3.bf16.msra.mxu1 %v1496_v48  ;;  %1202 = vmatprep.mubr.msk.bf16.mxu1 %vm1356_vm1, %v1354_v12 }
 0xe77   :  { %1200 = vmatprep.subr.bf16.mxu1 %v1354_v12 }
 0xe7a   :  { %1201 = vmatpush3.bf16.msra.mxu1 %v1505_v54 }
 0xf48   :  { %v713_v8 = vpop.f32.mrb[16].mxu1 }
 0xf49   :  { %v719_v9 = vadd.f32 %v713_v8, %v1549_v26  ;;  %v1188_v10 = vpop.f32.mrb[17].mxu1 }
 0xf4a   :  { %v716_v11 = vpop.f32.mrb[18].mxu1 }
 0xf4b   :  { %1270 = vtanh.f32 %v719_v9  ;;  %v1189_v13 = vpop.f32.mrb[19].mxu1 }
 0xf55   :  { %v1271_v14 = vpop.eup %1270 }
 0xf56   :  { %725 = vrot.lane.b32.xlu0 %v1271_v14, %s1357_s5  ;;  %v721_v15 = vadd.f32 1.0, %v1271_v14 }
 0xf58   :  { %v722_v18 = vmul.f32 0.5, %v721_v15 }
 0xf5a   :  { %v723_v16 = vmul.f32 %v722_v18, %v659_v2 }
 0xfc8   :  { %v726_v48 = vpop.permute.xlu0 %725 }
 0xfc9   :  { %v728_v19 = vmul.f32 %v726_v48, %v722_v18 }
 0xfcb   :  { %730 = vrot.lane.b32.xlu1 %v728_v19, %s1355_s24 }
0x103d   :  { %v731_v12 = vpop.permute.xlu1 %730 }
0x103e   :  { %v733_v17 = vadd.f32 %v731_v12, %v723_v16 }
0x1040   :  { %1272 = vtanh.f32 %v733_v17 }
0x104a   :  { %v1273_v54 = vpop.eup %1272 }
0x104b   :  { %736 = vrot.lane.b32.xlu0 %v1273_v54, %s1357_s5 }
0x10bd   :  { %v737_v26 = vpop.permute.xlu0 %736 }
0x10be   :  { %v1635_v21 = vmul.f32 %v737_v26, %v722_v18 }
0x10c0   :  { %v746_v23 = vpack.c.bf16 %v1635_v21, %v1635_v21  ;;  %v740_v8 = vmax.f32 %v1635_v21, 0.0 }
0x10c2   :  { %748 = vrot.lane.b32.xlu1 %v746_v23, %s1355_s24 }
0x1134   :  { %v749_v25 = vpop.permute.xlu1 %748 }
0x1135   :  { %1195 = vmatmul.mubr.msk.bf16.vlgmr.msra.gmra.mrb[12].mxu0 %vm205_vm0, %v749_v25 }
0x1136   :  { %1207 = vmatpush3.bf16.msra.mxu0 %v1248_v30 }
0x1137   :  { %1208 = vmatprep.subr.bf16.mxu0 %v1249_v22 }
0x113a   :  { %1209 = vmatpush3.bf16.msra.mxu0 %v1249_v22 }
0x1208   :  { %v787_v27 = vpop.f32.mrb[12].mxu0 }
0x1209   :  { %v793_v28 = vadd.f32 %v787_v27, %v1543_v20  ;;  %v1196_v29 = vpop.f32.mrb[13].mxu0 }
0x120a   :  { %v790_v31 = vpop.f32.mrb[14].mxu0 }
0x120b   :  { %1274 = vtanh.f32 %v793_v28  ;;  %v1197_v32 = vpop.f32.mrb[15].mxu0 }
0x1215   :  { %v1275_v33 = vpop.eup %1274 }
0x1216   :  { %799 = vrot.lane.b32.xlu0 %v1275_v33, %s1357_s5  ;;  %v795_v34 = vadd.f32 1.0, %v1275_v33 }
0x1218   :  { %v796_v35 = vmul.f32 0.5, %v795_v34 }
0x121a   :  { %v797_v39 = vmul.f32 %v796_v35, %v733_v17 }
0x1288   :  { %v800_v37 = vpop.permute.xlu0 %799 }
0x1289   :  { %v802_v38 = vmul.f32 %v800_v37, %v796_v35 }
0x128b   :  { %804 = vrot.lane.b32.xlu1 %v802_v38, %s1355_s24 }
0x12fd   :  { %v805_v40 = vpop.permute.xlu1 %804 }
0x12fe   :  { %v807_v41 = vadd.f32 %v805_v40, %v797_v39 }
0x1300   :  { %1276 = vtanh.f32 %v807_v41 }
0x130a   :  { %v1277_v42 = vpop.eup %1276 }
0x130b   :  { %810 = vrot.lane.b32.xlu0 %v1277_v42, %s1357_s5 }
0x137d   :  { %v811_v20 = vpop.permute.xlu0 %810 }
0x137e   :  { %v813_v43 = vmul.f32 %v811_v20, %v796_v35 }
0x1380   :  { %v820_v44 = vpack.c.bf16 %v813_v43, %v813_v43  ;;  %v814_v61 = vmax.f32 %v813_v43, 0.0 }
0x1382   :  { %822 = vrot.lane.b32.xlu1 %v820_v44, %s1355_s24 }
0x13f4   :  { %v823_v45 = vpop.permute.xlu1 %822 }
0x13f5   :  { %1203 = vmatmul.mubr.msk.bf16.vlgmr.msra.gmra.mrb[20].mxu1 %vm205_vm0, %v823_v45 }
0x14c8   :  { %v861_v46 = vpop.f32.mrb[20].mxu1 }
0x14c9   :  { %v867_v47 = vadd.f32 %v861_v46, %v1547_v24  ;;  %v1204_v36 = vpop.f32.mrb[21].mxu1  ;;  %v666_v24 = vmax.f32 %v1620_v4, 0.0  ;;  %v444_v4 = vmax.f32 %v1573_v7, 0.0 }
0x14ca   :  { %v864_v50 = vpop.f32.mrb[22].mxu1 }
0x14cb   :  { %1278 = vtanh.f32 %v867_v47  ;;  %v1205_v51 = vpop.f32.mrb[23].mxu1 }
0x14d5   :  { %v1279_v53 = vpop.eup %1278 }
0x14d6   :  { %873 = vrot.lane.b32.xlu0 %v1279_v53, %s1357_s5  ;;  %v869_v55 = vadd.f32 1.0, %v1279_v53 }
0x14d8   :  { %v870_v56 = vmul.f32 0.5, %v869_v55 }
0x14da   :  { %v871_v62 = vmul.f32 %v870_v56, %v807_v41 }
0x1548   :  { %v874_v57 = vpop.permute.xlu0 %873 }
0x1549   :  { %v876_v58 = vmul.f32 %v874_v57, %v870_v56 }
0x154b   :  { %878 = vrot.lane.b32.xlu1 %v876_v58, %s1355_s24 }
0x154f   :  { %372 = vrot.lane.b32.xlu1 %v370_v59, %s1355_s24 }
0x1553   :  { %520 = vrot.lane.b32.xlu1 %v518_v60, %s1355_s24 }
0x1557   :  { %668 = vrot.lane.b32.xlu1 %v666_v24, %s1355_s24 }
0x155b   :  { %816 = vrot.lane.b32.xlu1 %v814_v61, %s1355_s24 }
0x15bd   :  { %v879_v63 = vpop.permute.xlu1 %878 }
0x15be   :  { %v881_v0 = vadd.f32 %v879_v63, %v871_v62 }
0x15c0   :  { %1280 = vtanh.f32 %v881_v0 }
0x15c1   :  { %v373_v1 = vpop.permute.xlu1 %372 }
0x15c2   :  { %375 = vst.msk [vmem:[#allocation2] sm:$0xff] %vm205_vm0, %v373_v1 }
0x15c5   :  { %v521_v52 = vpop.permute.xlu1 %520 }
0x15c6   :  { %523 = vst.msk [vmem:[#allocation2 + $0x10] sm:$0xff] %vm205_vm0, %v521_v52 }
0x15c9   :  { %v669_v2 = vpop.permute.xlu1 %668  ;;  %v904_v14 = vld [vmem:[#allocation2] sm:$0xff] }
0x15ca   :  { %v1281_v3 = vpop.eup %1280  ;;  %671 = vst.msk [vmem:[#allocation2 + $0x20] sm:$0xff] %vm205_vm0, %v669_v2 }
0x15cb   :  { %884 = vrot.lane.b32.xlu0 %v1281_v3, %s1357_s5 }
0x15cd   :  { %v817_v5 = vpop.permute.xlu1 %816  ;;  %v906_v48 = vld [vmem:[#allocation2 + $0x10] sm:$0xff] }
0x15ce   :  { %819 = vst.msk [vmem:[#allocation2 + $0x30] sm:$0xff] %vm205_vm0, %v817_v5 }
0x15cf   :  { %446 = vrot.lane.b32.xlu0 %v444_v4, %s1355_s24 }
0x15d1   :  { %v908_v12 = vld [vmem:[#allocation2 + $0x20] sm:$0xff] }
0x15d3   :  { %594 = vrot.lane.b32.xlu0 %v592_v6, %s1355_s24 }
0x15d5   :  { %v910_v25 = vld [vmem:[#allocation2 + $0x30] sm:$0xff] }
0x15d7   :  { %742 = vrot.lane.b32.xlu0 %v740_v8, %s1355_s24 }
0x163d   :  { %v885_v9 = vpop.permute.xlu0 %884 }
0x163e   :  { %v887_v10 = vmul.f32 %v885_v9, %v870_v56 }
0x1640   :  { %v888_v11 = vmax.f32 %v887_v10, 0.0  ;;  %895 = vrot.lane.b32.xlu1 %v887_v10, %s1355_s24 }
0x1641   :  { %v447_v7 = vpop.permute.xlu0 %446 }
0x1642   :  { %449 = vst.msk [vmem:[#allocation2 + $0x8] sm:$0xff] %vm205_vm0, %v447_v7  ;;  %890 = vrot.lane.b32.xlu0 %v888_v11, %s1355_s24 }
0x1645   :  { %v595_v13 = vpop.permute.xlu0 %594 }
0x1646   :  { %597 = vst.msk [vmem:[#allocation2 + $0x18] sm:$0xff] %vm205_vm0, %v595_v13  ;;  %900 = vrot.lane.b32.xlu0 %v881_v0, %s1358_s6 }
0x1649   :  { %v743_v49 = vpop.permute.xlu0 %742  ;;  %v905_v15 = vld [vmem:[#allocation2 + $0x8] sm:$0xff] }
0x164a   :  { %745 = vst.msk [vmem:[#allocation2 + $0x28] sm:$0xff] %vm205_vm0, %v743_v49  ;;  %v912_v18 = vpack.c.bf16 %v905_v15, %v904_v14 }
0x164c   :  { %1210 = vmatprep.mubr.msk.bf16.mxu0 %vm205_vm0, %v912_v18 }
0x164d   :  { %v907_v19 = vld [vmem:[#allocation2 + $0x18] sm:$0xff] }
0x164e   :  { %v913_v16 = vpack.c.bf16 %v907_v19, %v906_v48 }
0x1650   :  { %1211 = vmatmul.mubr.msk.bf16.vlgmr.msra.gmra.mrb[16].mxu0 %vm205_vm0, %v913_v16 }
0x1651   :  { %v909_v17 = vld [vmem:[#allocation2 + $0x28] sm:$0xff] }
0x1652   :  { %v914_v54 = vpack.c.bf16 %v909_v17, %v908_v12 }
0x1654   :  { %1214 = vmatprep.mubr.msk.bf16.mxu0 %vm205_vm0, %v914_v54 }
0x16b2   :  { %v896_v26 = vpop.permute.xlu1 %895 }
0x16b3   :  { %898 = vst.msk [vmem:[#allocation5] sm:$0xff] %vm205_vm0, %v896_v26 }
0x16b4   :  { %v891_v21 = vpop.permute.xlu0 %890 }
0x16b5   :  { %893 = vst.msk [vmem:[#allocation2 + $0x38] sm:$0xff] %vm205_vm0, %v891_v21 }
0x16b8   :  { %v901_v23 = vpop.permute.xlu0 %900 }
0x16b9   :  { %903 = vst.msk [vmem:[#allocation7] sm:$0xff] %vm205_vm0, %v901_v23 }
0x16bc   :  { %v911_v27 = vld [vmem:[#allocation2 + $0x38] sm:$0xff] }
0x16bd   :  { %v915_v28 = vpack.c.bf16 %v911_v27, %v910_v25 }
0x16bf   :  { %1215 = vmatmul.mubr.msk.bf16.gmra.mrb[20].mxu0 %vm205_vm0, %v915_v28 }
0x16c0   :  { %1293 = shalt.err (!%p1290_p4)
}
0x16c1   :  { %s1294_s23 = scalar_lea.hbm %s1736_s11, 128 }
0x16c2   :  { %p1295_p5 = scmp.ne.s32.totalorder %s1736_s11, %s1294_s23  ;;  %p1298_p6 = scmp.lt.u32.totalorder %s1294_s23, %s1736_s11 }
0x16c4   :  { %p1300_p7 = pnand %p1298_p6, %p1295_p5 }
0x16c6   :  { %1303 = shalt.err (!%p1300_p7)
}
0x16c7   :  { %1045 = dma.vmem_to_hbm [thread:$0]  %s1043_s20, 128, %s1736_s11, [#allocation6]  }
0x16c8   :  { %s1360_s28 = smov [#allocation7]  }
0x16c9   :  { %s1052_s1 = sshll.u32 %s1360_s28, 4  ;;  %s1053_s1 = int_to_ptr.vmem [resolvable:$true] %s1052_s1 }
0x16ca   :  { %s1304_s2 = scalar_lea.vmem %s1053_s1, 128  ;;  %p1309_p9 = scmp.lt.s32.totalorder %s1053_s1, %s1053_s1 }
0x16cb   :  { %p1305_p8 = scmp.ne.s32.totalorder %s1053_s1, %s1304_s2  ;;  %p1310_p10 = scmp.lt.s32.totalorder %s1304_s2, %s1304_s2 }
0x16cd   :  { %p1311_p11 = por %p1310_p10, %p1309_p9 }
0x16cf   :  { %p1312_p12 = pnand %p1311_p11, %p1305_p8 }
0x16d1   :  { %1315 = shalt.err (!%p1312_p12)
}
0x16d2   :  { %s1316_s13 = scalar_lea.hbm %s1737_s12, 128 }
0x16d3   :  { %p1317_p13 = scmp.ne.s32.totalorder %s1737_s12, %s1316_s13  ;;  %p1320_p0 = scmp.lt.u32.totalorder %s1316_s13, %s1737_s12 }
0x16d5   :  { %p1322_p1 = pnand %p1320_p0, %p1317_p13 }
0x16d7   :  { %1325 = shalt.err (!%p1322_p1)
}
0x16d8   :  { %1055 = dma.vmem_to_hbm [thread:$0]  %s1053_s1, 128, %s1737_s12, [#allocation6]   ;;  %v1087_v29 = vld [vmem:[%s1732_s7] ss:$0 sm:$0xff] }
0x16d9   :  { %s1361_s18 = smov [#allocation3]  }
0x16da   :  { %s1029_s6 = sshll.u32 %s1361_s18, 4  ;;  %s1030_s6 = int_to_ptr.vmem [resolvable:$true] %s1029_s6 }
0x16db   :  { %s1326_s7 = scalar_lea.vmem %s1030_s6, 1024  ;;  %p1331_p3 = scmp.lt.s32.totalorder %s1030_s6, %s1030_s6 }
0x16dc   :  { %p1327_p2 = scmp.ne.s32.totalorder %s1030_s6, %s1326_s7  ;;  %p1332_p4 = scmp.lt.s32.totalorder %s1326_s7, %s1326_s7 }
0x16de   :  { %p1333_p5 = por %p1332_p4, %p1331_p3 }
0x16e0   :  { %p1334_p6 = pnand %p1333_p5, %p1327_p2 }
0x1723   :  { %v1212_v31 = vpop.f32.mrb[16].mxu0 }
0x1724   :  { %v994_v32 = vadd.f32 %v1212_v31, %v1087_v29  ;;  %v985_v33 = vpop.f32.mrb[17].mxu0 }
0x1725   :  { %v986_v34 = vadd.f32 %v1087_v29, %v985_v33  ;;  %v1213_v35 = vpop.f32.mrb[18].mxu0 }
0x1726   :  { %1018 = vst [vmem:[#allocation3 + $0x10] sm:$0xff] %v994_v32  ;;  %v997_v37 = vadd.f32 %v1213_v35, %v1087_v29  ;;  %v988_v38 = vpop.f32.mrb[19].mxu0 }
0x1727   :  { %1016 = vst [vmem:[#allocation3] sm:$0xff] %v986_v34  ;;  %v989_v39 = vadd.f32 %v1087_v29, %v988_v38 }
0x1728   :  { %1019 = vst [vmem:[#allocation3 + $0x18] sm:$0xff] %v997_v37 }
0x1729   :  { %1017 = vst [vmem:[#allocation3 + $0x8] sm:$0xff] %v989_v39 }
0x1792   :  { %v1216_v40 = vpop.f32.mrb[20].mxu0 }
0x1793   :  { %v1010_v41 = vadd.f32 %v1216_v40, %v1087_v29  ;;  %v1001_v42 = vpop.f32.mrb[21].mxu0 }
0x1794   :  { %v1002_v20 = vadd.f32 %v1087_v29, %v1001_v42  ;;  %v1217_v43 = vpop.f32.mrb[22].mxu0 }
0x1795   :  { %1022 = vst [vmem:[#allocation3 + $0x30] sm:$0xff] %v1010_v41  ;;  %v1013_v44 = vadd.f32 %v1217_v43, %v1087_v29  ;;  %v1004_v45 = vpop.f32.mrb[23].mxu0 }
0x1796   :  { %1020 = vst [vmem:[#allocation3 + $0x20] sm:$0xff] %v1002_v20  ;;  %v1005_v46 = vadd.f32 %v1087_v29, %v1004_v45 }
0x1797   :  { %1023 = vst [vmem:[#allocation3 + $0x38] sm:$0xff] %v1013_v44 }
0x1798   :  { %1021 = vst [vmem:[#allocation3 + $0x28] sm:$0xff] %v1005_v46 }
0x1799   :  { %1337 = shalt.err (!%p1334_p6)
}
0x179a   :  { %s1338_s20 = scalar_lea.hbm %s1735_s10, 1024 }
0x179b   :  { %p1339_p7 = scmp.ne.s32.totalorder %s1735_s10, %s1338_s20  ;;  %p1342_p8 = scmp.lt.u32.totalorder %s1338_s20, %s1735_s10 }
0x179d   :  { %p1344_p9 = pnand %p1342_p8, %p1339_p7 }
0x179f   :  { %1347 = shalt.err (!%p1344_p9)
}
0x17a0   :  { %s1362_s24 = smov 128   ;;  %s1363_s25 = smov 8  }
0x17a1   :  { %1035 = dma.vmem_to_hbm [thread:$0]  %s1030_s6, 1024, %s1735_s10, [#allocation4], %s1362_s24, %s1362_s24, %s1363_s25  }
0x17a2   :  { %1348 = dma.done.wait [#allocation4], 1024  }
0x17a3   :  { %1349 = vsyncadd [#allocation4], 4294966272 }
0x17a4   :  { %1350 = dma.done.wait [#allocation6], 256  }
0x17a5   :  { %1351 = vsyncadd [#allocation6], 4294967040 }
0x17a6   :  { %1065 = vsyncpa [#allocation4], 1 }
0x17a7   :  { %1066 = vsyncpa [#allocation6], 1 }

</bundles_post_ra>
